<compile_context>
chip_gen: v5e
topology: v5e:2x2
jax: 0.10.0
libtpu: 0.0.40
codegen_flags: <defaults>
</compile_context>

<pallas_src>
import functools
import math

import jax
import jax.numpy as jnp
from jax import lax
from jax.experimental import pallas as pl
from jax.experimental.pallas import tpu as pltpu


def _pairwise_prob_kernel(e_row_ref, e_col_ref, out_ref, *, prob_pow):
    # e_row_ref: (tm, D) block of embeddings (rows i)
    # e_col_ref: (tn, D) block of embeddings (rows j, contracted on D)
    logits = lax.dot_general(
        e_row_ref[...],
        e_col_ref[...],
        dimension_numbers=(((1,), (1,)), ((), ())),   # NT contraction, no .T
        preferred_element_type=jnp.float32,
    )
    if prob_pow == 1.0:
        # sigmoid(x) = 0.5*(tanh(x/2)+1): single EUP transcendental.
        probs = 0.5 * (jnp.tanh(0.5 * logits) + 1.0)
    elif prob_pow == 2.0:
        s = 0.5 * (jnp.tanh(0.5 * logits) + 1.0)
        probs = s * s
    else:
        # sigmoid(x)**p == exp(-p * log1p(exp(-x)))  (fused, 3 EUP ops,
        # better conditioned than sigmoid followed by a generic power).
        probs = jnp.exp(-jnp.float32(prob_pow) * jnp.log1p(jnp.exp(-logits)))
    out_ref[...] = probs.astype(out_ref.dtype)


def _round_up(x: int, m: int) -> int:
    return ((x + m - 1) // m) * m


def pairwise_embedding_probs(embeddings: jax.Array,
                             prob_pow: float = 1.0,
                             tile_m: int = 512,
                             tile_n: int = 512,
                             out_dtype=jnp.float32) -> jax.Array:
    """Compute sigmoid(E @ E.T) ** prob_pow with a Pallas TPU kernel."""
    n_nodes, emb_dim = embeddings.shape

    # Clamp tiles to the (128-aligned) problem size, then pad n_nodes so the
    # large output tiles can always be used (no divisibility requirement).
    n_min = _round_up(n_nodes, 128)
    tile_m = min(tile_m, n_min)
    tile_n = min(tile_n, n_min)
    n_pad = _round_up(n_nodes, math.lcm(tile_m, tile_n))

    e = embeddings
    if n_pad != n_nodes:
        e = jnp.pad(e, ((0, n_pad - n_nodes), (0, 0)))

    grid = (n_pad // tile_m, n_pad // tile_n)
    kernel = functools.partial(_pairwise_prob_kernel, prob_pow=float(prob_pow))

    out_bytes = n_pad * n_pad * jnp.dtype(out_dtype).itemsize
    in_bytes = 2 * n_pad * emb_dim * e.dtype.itemsize * max(grid)  # re-fetched tiles
    cost = pl.CostEstimate(
        flops=2 * n_pad * n_pad * emb_dim,
        transcendentals=n_pad * n_pad * (1 if float(prob_pow) in (1.0, 2.0) else 3),
        bytes_accessed=out_bytes + in_bytes,
    )

    # Double-buffered VMEM footprint (output tile dominates). Cap at 48 MiB so
    # the request is valid on every generation (v7x has 64 MiB physical VMEM).
    vmem_needed = 2 * (tile_m * tile_n * jnp.dtype(out_dtype).itemsize
                       + (tile_m + tile_n) * emb_dim * e.dtype.itemsize) + (4 << 20)
    vmem_limit = int(min(max(vmem_needed, 32 << 20), 48 << 20))

    out_padded = pl.pallas_call(
        kernel,
        out_shape=jax.ShapeDtypeStruct((n_pad, n_pad), out_dtype),
        grid_spec=pltpu.PrefetchScalarGridSpec(
            num_scalar_prefetch=0,
            grid=grid,
            in_specs=[
                # row-block of embeddings: (tile_m, emb_dim), full D per step
                pl.BlockSpec((tile_m, emb_dim), lambda i, j: (i, 0)),
                # col-block of embeddings: (tile_n, emb_dim), full D per step
                pl.BlockSpec((tile_n, emb_dim), lambda i, j: (j, 0)),
            ],
            out_specs=pl.BlockSpec((tile_m, tile_n), lambda i, j: (i, j)),
        ),
        compiler_params=pltpu.CompilerParams(
            dimension_semantics=("parallel", "parallel"),
            vmem_limit_bytes=vmem_limit,
        ),
        cost_estimate=cost,
    )(e, e)

    if n_pad != n_nodes:
        out_padded = out_padded[:n_nodes, :n_nodes]
    return out_padded


class PairwiseEmbeddingSamplerJAX:
    """Minimal JAX port of PairwiseEmbeddingSampler (forward + statistics)."""

    def __init__(self, n_nodes: int, embedding_dim: int,
                 prob_pow: float = 1.0, init_bounds: float = 0.001,
                 key: jax.Array | None = None):
        if key is None:
            key = jax.random.PRNGKey(0)
        # uniform(-init_bounds, init_bounds) init, like
        # embeddings.data.uniform_(-init_bounds, init_bounds)
        self.embeddings = jax.random.uniform(
            key, (n_nodes, embedding_dim), dtype=jnp.float32,
            minval=-init_bounds, maxval=init_bounds)
        self.prob_pow = prob_pow
        self.n_edges = n_nodes ** 2

    def forward(self) -> jax.Array:
        return pairwise_embedding_probs(self.embeddings, self.prob_pow)

    def statistics(self):
        probs = self.forward()
        total = float(jnp.sum(probs))
        return {
            "expected_num_edges": total,
            "percentage_edges_expected": total / self.n_edges,
        }

    # TODO(synk): Sampler.sample (Bernoulli edge sampling) is outside this
    # module's forward pass and is not implemented here.


if __name__ == "__main__":
    key = jax.random.PRNGKey(0)

    # Case 1: general prob_pow path (fused exp/log1p epilogue).
    n_nodes, embedding_dim, prob_pow = 256, 32, 1.5
    model = PairwiseEmbeddingSamplerJAX(
        n_nodes, embedding_dim, prob_pow=prob_pow, init_bounds=0.001, key=key)
    probs = jax.block_until_ready(model.forward())
    e = model.embeddings
    ref = jax.nn.sigmoid(e @ e.T) ** jnp.float32(prob_pow)
    assert probs.shape == (n_nodes, n_nodes)
    assert jnp.allclose(probs, ref, atol=1e-6, rtol=1e-5), "mismatch vs reference (p=1.5)"
    _ = model.statistics()

    # Case 2: non-128-multiple n_nodes (exercises padding) + prob_pow == 1 path.
    n2 = 200
    model2 = PairwiseEmbeddingSamplerJAX(
        n2, embedding_dim, prob_pow=1.0, init_bounds=0.001,
        key=jax.random.PRNGKey(1))
    probs2 = jax.block_until_ready(model2.forward())
    e2 = model2.embeddings
    ref2 = jax.nn.sigmoid(e2 @ e2.T)
    assert probs2.shape == (n2, n2)
    assert jnp.allclose(probs2, ref2, atol=1e-6, rtol=1e-5), "mismatch vs reference (p=1.0)"

    print("KERNEL_OK")
</pallas_src>

<mosaic_0001>
module attributes {stable_mosaic.version = 11 : i64} {
  func.func @_pairwise_prob_kernel(%arg0: i32, %arg1: i32, %arg2: memref<256x32xf32, #tpu.memory_space<vmem>>, %arg3: memref<256x32xf32, #tpu.memory_space<vmem>>, %arg4: memref<256x256xf32, #tpu.memory_space<vmem>>) attributes {dimension_semantics = [#tpu.dimension_semantics<parallel>, #tpu.dimension_semantics<parallel>], iteration_bounds = array<i64: 1, 1>, scalar_prefetch = 0 : i64, scratch_operands = 0 : i64, tpu.core_type = #tpu.core_type<tc>, window_params = [{transform_indices = @transform_0, window_bounds = array<i64: 256, 32>}, {transform_indices = @transform_1, window_bounds = array<i64: 256, 32>}, {transform_indices = @transform_2, window_bounds = array<i64: 256, 256>}]} {
    %c0 = arith.constant 0 : index
    %c0_0 = arith.constant 0 : index
    %0 = vector.load %arg2[%c0, %c0_0] : memref<256x32xf32, #tpu.memory_space<vmem>>, vector<256x32xf32>
    %c0_1 = arith.constant 0 : index
    %c0_2 = arith.constant 0 : index
    %1 = vector.load %arg3[%c0_1, %c0_2] : memref<256x32xf32, #tpu.memory_space<vmem>>, vector<256x32xf32>
    %cst = arith.constant dense<0.000000e+00> : vector<256x256xf32>
    %2 = tpu.matmul %0, %1, %cst {dimension_numbers = #tpu.dot_dimension_numbers<[1], [1], [0], [0], [0, 0, 1, 0], [], []>} : vector<256x32xf32>, vector<256x32xf32>, vector<256x256xf32> -> vector<256x256xf32>
    %cst_3 = arith.constant 0.000000e+00 : f32
    %cst_4 = arith.constant 1.500000e+00 : f32
    %3 = arith.subf %cst_3, %cst_4 : f32
    %cst_5 = arith.constant 0.000000e+00 : f32
    %4 = vector.broadcast %cst_5 : f32 to vector<256x256xf32>
    %5 = arith.subf %4, %2 : vector<256x256xf32>
    %6 = math.exp %5 : vector<256x256xf32>
    %7 = math.log1p %6 : vector<256x256xf32>
    %8 = vector.broadcast %3 : f32 to vector<256x256xf32>
    %9 = arith.mulf %8, %7 : vector<256x256xf32>
    %10 = math.exp %9 : vector<256x256xf32>
    %c0_6 = arith.constant 0 : index
    %c0_7 = arith.constant 0 : index
    %11 = vector.load %arg4[%c0_6, %c0_7] : memref<256x256xf32, #tpu.memory_space<vmem>>, vector<256x256xf32>
    tpu.vector_store %arg4[%c0_6, %c0_7], %10 {strides = array<i32>} : memref<256x256xf32, #tpu.memory_space<vmem>>, vector<256x256xf32>,
    return
  }
  func.func @transform_0(%arg0: i32, %arg1: i32) -> (i32, i32) {
    %c0_i32 = arith.constant 0 : i32
    %c0_i32_0 = arith.constant 0 : i32
    return %arg0, %c0_i32 : i32, i32
  }
  func.func @transform_1(%arg0: i32, %arg1: i32) -> (i32, i32) {
    %c0_i32 = arith.constant 0 : i32
    %c0_i32_0 = arith.constant 0 : i32
    return %arg1, %c0_i32 : i32, i32
  }
  func.func @transform_2(%arg0: i32, %arg1: i32) -> (i32, i32) {
    %c0_i32 = arith.constant 0 : i32
    return %arg0, %arg1 : i32, i32
  }
}

</mosaic_0001>

<bundles_post_ra>
// kernel: tpu_custom_call.1
= control target key start
LH: loop header
LB: loop body
LE: loop exit
PB: predicated region body
PF: predicated region fallthrough
CT: control target
= control target key end

     0   :  { %vm76_vm0 = vcmask 261120   ;;  %s2907_s0 = inlined_call_operand.vmem [shape: f32[256,32], index: 0, kind: input, shape index: {}]   ;;  %s2908_s1 = inlined_call_operand.vmem [shape: f32[256,32], index: 1, kind: input, shape index: {}]   ;;  %s2909_s2 = inlined_call_operand.hbm [shape: f32[256,256], index: 2, kind: output, shape index: {}]  }
   0x1   :  { %v59_v0 = vld [vmem:[%s2908_s1 + $0x78] sm:$0xff]  ;;  %v58_v2 = vld [vmem:[%s2908_s1 + $0x70] sm:$0xff]  ;;  %v57_v4 = vld [vmem:[%s2908_s1 + $0x68] sm:$0xff] }
   0x2   :  { %v75_v1 = vld [vmem:[%s2908_s1 + $0xf8] sm:$0xff]  ;;  %1537 = vmatpush.xpose.msk.msra.mxu0 %vm76_vm0, %v59_v0  ;;  %1633 = vmatpush.xpose.msk.msra.mxu2 %vm76_vm0, %v59_v0  ;;  %v74_v3 = vld [vmem:[%s2908_s1 + $0xf0] sm:$0xff]  ;;  %v73_v5 = vld [vmem:[%s2908_s1 + $0xe8] sm:$0xff] }
   0x3   :  { %1585 = vmatpush.xpose.msk.msra.mxu1 %vm76_vm0, %v75_v1  ;;  %1649 = vmatpush.xpose.msk.msra.mxu3 %vm76_vm0, %v75_v1 }
   0x6   :  { %1538 = vmatpush.xpose.msk.msra.mxu0 %vm76_vm0, %v58_v2  ;;  %1634 = vmatpush.xpose.msk.msra.mxu2 %vm76_vm0, %v58_v2 }
   0x7   :  { %1586 = vmatpush.xpose.msk.msra.mxu1 %vm76_vm0, %v74_v3  ;;  %1650 = vmatpush.xpose.msk.msra.mxu3 %vm76_vm0, %v74_v3 }
   0x8   :  { %7 = vsyncpa [#allocation3], 0  ;;  %v56_v6 = vld [vmem:[%s2908_s1 + $0x60] sm:$0xff]  ;;  %v55_v8 = vld [vmem:[%s2908_s1 + $0x58] sm:$0xff]  ;;  %s1525_s25 = sshll.u32 %s2909_s2, 4  ;;  %s2079_s26 = smov 256   ;;  %s1526_s25 = int_to_ptr.hbm [resolvable:$true] %s1525_s25 }
   0x9   :  { %v72_v7 = vld [vmem:[%s2908_s1 + $0xe0] sm:$0xff]  ;;  %v71_v9 = vld [vmem:[%s2908_s1 + $0xd8] sm:$0xff]  ;;  %v54_v10 = vld [vmem:[%s2908_s1 + $0x50] sm:$0xff]  ;;  %s2080_s27 = smov 16  }
   0xa   :  { %1539 = vmatpush.xpose.msk.msra.mxu0 %vm76_vm0, %v57_v4  ;;  %1635 = vmatpush.xpose.msk.msra.mxu2 %vm76_vm0, %v57_v4  ;;  %v70_v11 = vld [vmem:[%s2908_s1 + $0xd0] sm:$0xff]  ;;  %v53_v12 = vld [vmem:[%s2908_s1 + $0x48] sm:$0xff]  ;;  %v52_v14 = vld [vmem:[%s2908_s1 + $0x40] sm:$0xff] }
   0xb   :  { %1587 = vmatpush.xpose.msk.msra.mxu1 %vm76_vm0, %v73_v5  ;;  %1651 = vmatpush.xpose.msk.msra.mxu3 %vm76_vm0, %v73_v5  ;;  %v69_v13 = vld [vmem:[%s2908_s1 + $0xc8] sm:$0xff]  ;;  %v68_v15 = vld [vmem:[%s2908_s1 + $0xc0] sm:$0xff]  ;;  %v51_v16 = vld [vmem:[%s2908_s1 + $0x38] sm:$0xff] }
   0xc   :  { %v67_v17 = vld [vmem:[%s2908_s1 + $0xb8] sm:$0xff]  ;;  %v50_v18 = vld [vmem:[%s2908_s1 + $0x30] sm:$0xff]  ;;  %v49_v20 = vld [vmem:[%s2908_s1 + $0x28] sm:$0xff] }
   0xd   :  { %v66_v19 = vld [vmem:[%s2908_s1 + $0xb0] sm:$0xff]  ;;  %v65_v21 = vld [vmem:[%s2908_s1 + $0xa8] sm:$0xff]  ;;  %v48_v22 = vld [vmem:[%s2908_s1 + $0x20] sm:$0xff] }
   0xe   :  { %1540 = vmatpush.xpose.msk.msra.mxu0 %vm76_vm0, %v56_v6  ;;  %1636 = vmatpush.xpose.msk.msra.mxu2 %vm76_vm0, %v56_v6  ;;  %v64_v23 = vld [vmem:[%s2908_s1 + $0xa0] sm:$0xff]  ;;  %v47_v24 = vld [vmem:[%s2908_s1 + $0x18] sm:$0xff]  ;;  %v46_v26 = vld [vmem:[%s2908_s1 + $0x10] sm:$0xff] }
   0xf   :  { %1588 = vmatpush.xpose.msk.msra.mxu1 %vm76_vm0, %v72_v7  ;;  %1652 = vmatpush.xpose.msk.msra.mxu3 %vm76_vm0, %v72_v7  ;;  %v63_v25 = vld [vmem:[%s2908_s1 + $0x98] sm:$0xff]  ;;  %v62_v27 = vld [vmem:[%s2908_s1 + $0x90] sm:$0xff]  ;;  %v45_v28 = vld [vmem:[%s2908_s1 + $0x8] sm:$0xff] }
  0x10   :  { %v61_v29 = vld [vmem:[%s2908_s1 + $0x88] sm:$0xff]  ;;  %v44_v30 = vld [vmem:[%s2908_s1] sm:$0xff]  ;;  %v14_v36 = vld [vmem:[%s2907_s0 + $0x10] sm:$0xff] }
  0x11   :  { %v60_v31 = vld [vmem:[%s2908_s1 + $0x80] sm:$0xff]  ;;  %v13_v34 = vld [vmem:[%s2907_s0 + $0x8] sm:$0xff]  ;;  %v30_v37 = vld [vmem:[%s2907_s0 + $0x90] sm:$0xff] }
  0x12   :  { %1541 = vmatpush.xpose.msk.msra.mxu0 %vm76_vm0, %v55_v8  ;;  %1637 = vmatpush.xpose.msk.msra.mxu2 %vm76_vm0, %v55_v8  ;;  %v12_v32 = vld [vmem:[%s2907_s0] sm:$0xff]  ;;  %v29_v35 = vld [vmem:[%s2907_s0 + $0x88] sm:$0xff]  ;;  %v15_v38 = vld [vmem:[%s2907_s0 + $0x18] sm:$0xff] }
  0x13   :  { %1589 = vmatpush.xpose.msk.msra.mxu1 %vm76_vm0, %v71_v9  ;;  %1653 = vmatpush.xpose.msk.msra.mxu3 %vm76_vm0, %v71_v9  ;;  %v28_v33 = vld [vmem:[%s2907_s0 + $0x80] sm:$0xff]  ;;  %v31_v39 = vld [vmem:[%s2907_s0 + $0x98] sm:$0xff]  ;;  %v17_v42 = vld [vmem:[%s2907_s0 + $0x28] sm:$0xff] }
  0x14   :  { %v16_v40 = vld [vmem:[%s2907_s0 + $0x20] sm:$0xff]  ;;  %v33_v43 = vld [vmem:[%s2907_s0 + $0xa8] sm:$0xff]  ;;  %v18_v44 = vld [vmem:[%s2907_s0 + $0x30] sm:$0xff] }
  0x15   :  { %v32_v41 = vld [vmem:[%s2907_s0 + $0xa0] sm:$0xff]  ;;  %v34_v45 = vld [vmem:[%s2907_s0 + $0xb0] sm:$0xff]  ;;  %v19_v46 = vld [vmem:[%s2907_s0 + $0x38] sm:$0xff] }
  0x16   :  { %1542 = vmatpush.xpose.msk.msra.mxu0 %vm76_vm0, %v54_v10  ;;  %1638 = vmatpush.xpose.msk.msra.mxu2 %vm76_vm0, %v54_v10  ;;  %v35_v47 = vld [vmem:[%s2907_s0 + $0xb8] sm:$0xff]  ;;  %v20_v48 = vld [vmem:[%s2907_s0 + $0x40] sm:$0xff]  ;;  %v21_v50 = vld [vmem:[%s2907_s0 + $0x48] sm:$0xff] }
  0x17   :  { %1590 = vmatpush.xpose.msk.msra.mxu1 %vm76_vm0, %v70_v11  ;;  %1654 = vmatpush.xpose.msk.msra.mxu3 %vm76_vm0, %v70_v11  ;;  %v36_v49 = vld [vmem:[%s2907_s0 + $0xc0] sm:$0xff]  ;;  %v37_v51 = vld [vmem:[%s2907_s0 + $0xc8] sm:$0xff]  ;;  %v22_v52 = vld [vmem:[%s2907_s0 + $0x50] sm:$0xff] }
  0x18   :  { %v38_v53 = vld [vmem:[%s2907_s0 + $0xd0] sm:$0xff]  ;;  %v23_v54 = vld [vmem:[%s2907_s0 + $0x58] sm:$0xff]  ;;  %v24_v56 = vld [vmem:[%s2907_s0 + $0x60] sm:$0xff] }
  0x19   :  { %v39_v55 = vld [vmem:[%s2907_s0 + $0xd8] sm:$0xff]  ;;  %v40_v57 = vld [vmem:[%s2907_s0 + $0xe0] sm:$0xff]  ;;  %v25_v58 = vld [vmem:[%s2907_s0 + $0x68] sm:$0xff] }
  0x1a   :  { %1543 = vmatpush.xpose.msk.msra.mxu0 %vm76_vm0, %v53_v12  ;;  %1639 = vmatpush.xpose.msk.msra.mxu2 %vm76_vm0, %v53_v12  ;;  %v41_v59 = vld [vmem:[%s2907_s0 + $0xe8] sm:$0xff]  ;;  %v26_v60 = vld [vmem:[%s2907_s0 + $0x70] sm:$0xff]  ;;  %v27_v62 = vld [vmem:[%s2907_s0 + $0x78] sm:$0xff] }
  0x1b   :  { %1591 = vmatpush.xpose.msk.msra.mxu1 %vm76_vm0, %v69_v13  ;;  %1655 = vmatpush.xpose.msk.msra.mxu3 %vm76_vm0, %v69_v13  ;;  %v42_v61 = vld [vmem:[%s2907_s0 + $0xf0] sm:$0xff]  ;;  %v43_v63 = vld [vmem:[%s2907_s0 + $0xf8] sm:$0xff]  ;;  %s2078_s0 = smov [#allocation2]  }
  0x1c   :  { %s1523_s22 = sshll.u32 %s2078_s0, 4  ;;  %s1524_s22 = int_to_ptr.vmem [resolvable:$true] %s1523_s22 }
  0x1e   :  { %1544 = vmatpush.xpose.msk.msra.mxu0 %vm76_vm0, %v52_v14  ;;  %1640 = vmatpush.xpose.msk.msra.mxu2 %vm76_vm0, %v52_v14 }
  0x1f   :  { %1592 = vmatpush.xpose.msk.msra.mxu1 %vm76_vm0, %v68_v15  ;;  %1656 = vmatpush.xpose.msk.msra.mxu3 %vm76_vm0, %v68_v15 }
  0x22   :  { %1545 = vmatpush.xpose.msk.msra.mxu0 %vm76_vm0, %v51_v16  ;;  %1641 = vmatpush.xpose.msk.msra.mxu2 %vm76_vm0, %v51_v16 }
  0x23   :  { %1593 = vmatpush.xpose.msk.msra.mxu1 %vm76_vm0, %v67_v17  ;;  %1657 = vmatpush.xpose.msk.msra.mxu3 %vm76_vm0, %v67_v17 }
  0x26   :  { %1546 = vmatpush.xpose.msk.msra.mxu0 %vm76_vm0, %v50_v18  ;;  %1642 = vmatpush.xpose.msk.msra.mxu2 %vm76_vm0, %v50_v18 }
  0x27   :  { %1594 = vmatpush.xpose.msk.msra.mxu1 %vm76_vm0, %v66_v19  ;;  %1658 = vmatpush.xpose.msk.msra.mxu3 %vm76_vm0, %v66_v19 }
  0x2a   :  { %1547 = vmatpush.xpose.msk.msra.mxu0 %vm76_vm0, %v49_v20  ;;  %1643 = vmatpush.xpose.msk.msra.mxu2 %vm76_vm0, %v49_v20 }
  0x2b   :  { %1595 = vmatpush.xpose.msk.msra.mxu1 %vm76_vm0, %v65_v21  ;;  %1659 = vmatpush.xpose.msk.msra.mxu3 %vm76_vm0, %v65_v21 }
  0x2e   :  { %1548 = vmatpush.xpose.msk.msra.mxu0 %vm76_vm0, %v48_v22  ;;  %1644 = vmatpush.xpose.msk.msra.mxu2 %vm76_vm0, %v48_v22 }
  0x2f   :  { %1596 = vmatpush.xpose.msk.msra.mxu1 %vm76_vm0, %v64_v23  ;;  %1660 = vmatpush.xpose.msk.msra.mxu3 %vm76_vm0, %v64_v23 }
  0x32   :  { %1549 = vmatpush.xpose.msk.msra.mxu0 %vm76_vm0, %v47_v24  ;;  %1645 = vmatpush.xpose.msk.msra.mxu2 %vm76_vm0, %v47_v24 }
  0x33   :  { %1597 = vmatpush.xpose.msk.msra.mxu1 %vm76_vm0, %v63_v25  ;;  %1661 = vmatpush.xpose.msk.msra.mxu3 %vm76_vm0, %v63_v25 }
  0x36   :  { %1550 = vmatpush.xpose.msk.msra.mxu0 %vm76_vm0, %v46_v26  ;;  %1646 = vmatpush.xpose.msk.msra.mxu2 %vm76_vm0, %v46_v26 }
  0x37   :  { %1598 = vmatpush.xpose.msk.msra.mxu1 %vm76_vm0, %v62_v27  ;;  %1662 = vmatpush.xpose.msk.msra.mxu3 %vm76_vm0, %v62_v27 }
  0x3a   :  { %1551 = vmatpush.xpose.msk.msra.mxu0 %vm76_vm0, %v45_v28  ;;  %1647 = vmatpush.xpose.msk.msra.mxu2 %vm76_vm0, %v45_v28 }
  0x3b   :  { %1599 = vmatpush.xpose.msk.msra.mxu1 %vm76_vm0, %v61_v29  ;;  %1663 = vmatpush.xpose.msk.msra.mxu3 %vm76_vm0, %v61_v29 }
  0x3e   :  { %1552 = vmatpush.xpose.msk.msra.mxu0 %vm76_vm0, %v44_v30  ;;  %1648 = vmatpush.xpose.msk.msra.mxu2 %vm76_vm0, %v44_v30 }
  0x3f   :  { %1600 = vmatpush.xpose.msk.msra.mxu1 %vm76_vm0, %v60_v31  ;;  %1664 = vmatpush.xpose.msk.msra.mxu3 %vm76_vm0, %v60_v31 }
  0x41   :  { %1553 = vmatmul.msk.f32.vlgmr.msra.gmra.mxu0 %vm76_vm0, %v12_v32  ;;  %1569 = vmatmul.msk.f32.vlgmr.msra.gmra.mxu2 %vm76_vm0, %v28_v33 }
  0x42   :  { %1601 = vmatmul.msk.f32.vlgmr.msra.gmra.mxu1 %vm76_vm0, %v12_v32  ;;  %1617 = vmatmul.msk.f32.vlgmr.msra.gmra.mxu3 %vm76_vm0, %v28_v33 }
  0x49   :  { %1554 = vmatmul.msk.f32.gmra.mxu0 %vm76_vm0, %v13_v34  ;;  %1570 = vmatmul.msk.f32.gmra.mxu2 %vm76_vm0, %v29_v35 }
  0x4a   :  { %1602 = vmatmul.msk.f32.gmra.mxu1 %vm76_vm0, %v13_v34  ;;  %1618 = vmatmul.msk.f32.gmra.mxu3 %vm76_vm0, %v29_v35 }
  0x51   :  { %1555 = vmatmul.msk.f32.gmra.mxu0 %vm76_vm0, %v14_v36  ;;  %1571 = vmatmul.msk.f32.gmra.mxu2 %vm76_vm0, %v30_v37 }
  0x52   :  { %1603 = vmatmul.msk.f32.gmra.mxu1 %vm76_vm0, %v14_v36  ;;  %1619 = vmatmul.msk.f32.gmra.mxu3 %vm76_vm0, %v30_v37 }
  0x59   :  { %1556 = vmatmul.msk.f32.gmra.mxu0 %vm76_vm0, %v15_v38  ;;  %1572 = vmatmul.msk.f32.gmra.mxu2 %vm76_vm0, %v31_v39 }
  0x5a   :  { %1604 = vmatmul.msk.f32.gmra.mxu1 %vm76_vm0, %v15_v38  ;;  %1620 = vmatmul.msk.f32.gmra.mxu3 %vm76_vm0, %v31_v39 }
  0x61   :  { %1557 = vmatmul.msk.f32.gmra.mxu0 %vm76_vm0, %v16_v40  ;;  %1573 = vmatmul.msk.f32.gmra.mxu2 %vm76_vm0, %v32_v41 }
  0x62   :  { %1605 = vmatmul.msk.f32.gmra.mxu1 %vm76_vm0, %v16_v40  ;;  %1621 = vmatmul.msk.f32.gmra.mxu3 %vm76_vm0, %v32_v41 }
  0x69   :  { %1558 = vmatmul.msk.f32.gmra.mxu0 %vm76_vm0, %v17_v42  ;;  %1574 = vmatmul.msk.f32.gmra.mxu2 %vm76_vm0, %v33_v43 }
  0x6a   :  { %1606 = vmatmul.msk.f32.gmra.mxu1 %vm76_vm0, %v17_v42  ;;  %1622 = vmatmul.msk.f32.gmra.mxu3 %vm76_vm0, %v33_v43 }
  0x71   :  { %1559 = vmatmul.msk.f32.gmra.mxu0 %vm76_vm0, %v18_v44  ;;  %1575 = vmatmul.msk.f32.gmra.mxu2 %vm76_vm0, %v34_v45 }
  0x72   :  { %1607 = vmatmul.msk.f32.gmra.mxu1 %vm76_vm0, %v18_v44  ;;  %1623 = vmatmul.msk.f32.gmra.mxu3 %vm76_vm0, %v34_v45 }
  0x79   :  { %1560 = vmatmul.msk.f32.gmra.mxu0 %vm76_vm0, %v19_v46  ;;  %1576 = vmatmul.msk.f32.gmra.mxu2 %vm76_vm0, %v35_v47 }
  0x7a   :  { %1608 = vmatmul.msk.f32.gmra.mxu1 %vm76_vm0, %v19_v46  ;;  %1624 = vmatmul.msk.f32.gmra.mxu3 %vm76_vm0, %v35_v47 }
  0x81   :  { %1561 = vmatmul.msk.f32.gmra.mxu0 %vm76_vm0, %v20_v48  ;;  %1577 = vmatmul.msk.f32.gmra.mxu2 %vm76_vm0, %v36_v49 }
  0x82   :  { %1609 = vmatmul.msk.f32.gmra.mxu1 %vm76_vm0, %v20_v48  ;;  %1625 = vmatmul.msk.f32.gmra.mxu3 %vm76_vm0, %v36_v49 }
  0x89   :  { %1562 = vmatmul.msk.f32.gmra.mxu0 %vm76_vm0, %v21_v50  ;;  %1578 = vmatmul.msk.f32.gmra.mxu2 %vm76_vm0, %v37_v51 }
  0x8a   :  { %1610 = vmatmul.msk.f32.gmra.mxu1 %vm76_vm0, %v21_v50  ;;  %1626 = vmatmul.msk.f32.gmra.mxu3 %vm76_vm0, %v37_v51 }
  0x91   :  { %1563 = vmatmul.msk.f32.gmra.mxu0 %vm76_vm0, %v22_v52  ;;  %1579 = vmatmul.msk.f32.gmra.mxu2 %vm76_vm0, %v38_v53 }
  0x92   :  { %1611 = vmatmul.msk.f32.gmra.mxu1 %vm76_vm0, %v22_v52  ;;  %1627 = vmatmul.msk.f32.gmra.mxu3 %vm76_vm0, %v38_v53 }
  0x99   :  { %1564 = vmatmul.msk.f32.gmra.mxu0 %vm76_vm0, %v23_v54  ;;  %1580 = vmatmul.msk.f32.gmra.mxu2 %vm76_vm0, %v39_v55 }
  0x9a   :  { %1612 = vmatmul.msk.f32.gmra.mxu1 %vm76_vm0, %v23_v54  ;;  %1628 = vmatmul.msk.f32.gmra.mxu3 %vm76_vm0, %v39_v55 }
  0xa1   :  { %1565 = vmatmul.msk.f32.gmra.mxu0 %vm76_vm0, %v24_v56  ;;  %1581 = vmatmul.msk.f32.gmra.mxu2 %vm76_vm0, %v40_v57 }
  0xa2   :  { %1613 = vmatmul.msk.f32.gmra.mxu1 %vm76_vm0, %v24_v56  ;;  %1629 = vmatmul.msk.f32.gmra.mxu3 %vm76_vm0, %v40_v57 }
  0xa9   :  { %1566 = vmatmul.msk.f32.gmra.mxu0 %vm76_vm0, %v25_v58  ;;  %1582 = vmatmul.msk.f32.gmra.mxu2 %vm76_vm0, %v41_v59 }
  0xaa   :  { %1614 = vmatmul.msk.f32.gmra.mxu1 %vm76_vm0, %v25_v58  ;;  %1630 = vmatmul.msk.f32.gmra.mxu3 %vm76_vm0, %v41_v59 }
  0xb1   :  { %1567 = vmatmul.msk.f32.gmra.mxu0 %vm76_vm0, %v26_v60  ;;  %1583 = vmatmul.msk.f32.gmra.mxu2 %vm76_vm0, %v42_v61 }
  0xb2   :  { %1615 = vmatmul.msk.f32.gmra.mxu1 %vm76_vm0, %v26_v60  ;;  %1631 = vmatmul.msk.f32.gmra.mxu3 %vm76_vm0, %v42_v61 }
  0xb9   :  { %1568 = vmatmul.msk.f32.gmra.mxu0 %vm76_vm0, %v27_v62  ;;  %1584 = vmatmul.msk.f32.gmra.mxu2 %vm76_vm0, %v43_v63 }
  0xba   :  { %1616 = vmatmul.msk.f32.gmra.mxu1 %vm76_vm0, %v27_v62  ;;  %1632 = vmatmul.msk.f32.gmra.mxu3 %vm76_vm0, %v43_v63 }
  0xbe   :  { %v286_v0 = vpop.f32.mrf.mxu0 }
  0xbf   :  { %v495_v1 = vsub.f32 0.0, %v286_v0  ;;  %v399_v2 = vpop.f32.mrf.mxu1 }
  0xc0   :  { %v496_v3 = vsub.f32 0.0, %v399_v2 }
  0xc1   :  { %v559_v4 = vmul.f32 1.442695, %v495_v1 }
  0xc2   :  { %v561_v5 = vmul.f32 1.442695, %v496_v3 }
  0xc3   :  { %1668 = vpow2.f32 %v559_v4 }
  0xc4   :  { %1670 = vpow2.f32 %v561_v5  ;;  %v334_v6 = vpop.f32.mrf.mxu2 }
  0xc5   :  { %v527_v7 = vsub.f32 0.0, %v334_v6  ;;  %v447_v8 = vpop.f32.mrf.mxu3 }
  0xc6   :  { %v528_v9 = vsub.f32 0.0, %v447_v8  ;;  %v289_v10 = vpop.f32.mrf.mxu0 }
  0xc7   :  { %v623_v11 = vmul.f32 1.442695, %v527_v7  ;;  %v497_v12 = vsub.f32 0.0, %v289_v10  ;;  %v402_v13 = vpop.f32.mrf.mxu1 }
  0xc8   :  { %v625_v14 = vmul.f32 1.442695, %v528_v9  ;;  %v498_v15 = vsub.f32 0.0, %v402_v13 }
  0xc9   :  { %v1669_v16 = vpop.eup %1668  ;;  %1672 = vpow2.f32 %v623_v11  ;;  %v563_v17 = vmul.f32 1.442695, %v497_v12 }
  0xca   :  { %v1671_v18 = vpop.eup %1670  ;;  %v687_v19 = vadd.f32 1.0, %v1669_v16  ;;  %v690_v20 = vmul.f32 -0.5, %v1669_v16  ;;  %v693_v21 = vand.u32 2147483647, %v1669_v16  ;;  %1674 = vpow2.f32 %v625_v14 }
  0xcb   :  { %v696_v22 = vadd.f32 1.0, %v1671_v18  ;;  %v699_v23 = vmul.f32 -0.5, %v1671_v18  ;;  %v702_v24 = vand.u32 2147483647, %v1671_v18  ;;  %1676 = vpow2.f32 %v563_v17 }
  0xcc   :  { %1678 = vlog2.f32 %v687_v19  ;;  %v691_v25 = vadd.f32 1.0, %v690_v20  ;;  %v565_v26 = vmul.f32 1.442695, %v498_v15  ;;  %v337_v27 = vpop.f32.mrf.mxu2  ;;  %vm2416_vm1 = vcmp.lt.f32.partialorder %v693_v21, 0.0004427343 }
  0xcd   :  { %1680 = vlog2.f32 %v696_v22  ;;  %v700_v28 = vadd.f32 1.0, %v699_v23  ;;  %v529_v29 = vsub.f32 0.0, %v337_v27  ;;  %v450_v30 = vpop.f32.mrf.mxu3  ;;  %vm2422_vm2 = vcmp.lt.f32.partialorder %v702_v24, 0.0004427343 }
  0xce   :  { %1682 = vpow2.f32 %v565_v26  ;;  %v530_v32 = vsub.f32 0.0, %v450_v30  ;;  %v2420_v33 = vpop.f32.mrf.mxu0  ;;  %v692_v35 = vmul.f32 %v1669_v16, %v691_v25 }
  0xcf   :  { %v1673_v34 = vpop.eup %1672  ;;  %v701_v36 = vmul.f32 %v1671_v18, %v700_v28  ;;  %v627_v38 = vmul.f32 1.442695, %v529_v29  ;;  %v499_v43 = vsub.f32 0.0, %v2420_v33  ;;  %v2437_v0 = vpop.f32.mrf.mxu1 }
  0xd0   :  { %v1675_v39 = vpop.eup %1674  ;;  %v975_v40 = vadd.f32 1.0, %v1673_v34  ;;  %v978_v41 = vmul.f32 -0.5, %v1673_v34  ;;  %v981_v42 = vand.u32 2147483647, %v1673_v34  ;;  %v629_v51 = vmul.f32 1.442695, %v530_v32 }
  0xd1   :  { %v1677_v44 = vpop.eup %1676  ;;  %v984_v45 = vadd.f32 1.0, %v1675_v39  ;;  %v987_v46 = vmul.f32 -0.5, %v1675_v39  ;;  %v990_v47 = vand.u32 2147483647, %v1675_v39  ;;  %1684 = vpow2.f32 %v627_v38 }
  0xd2   :  { %v1679_v48 = vpop.eup %1678  ;;  %1686 = vlog2.f32 %v975_v40  ;;  %v979_v49 = vadd.f32 1.0, %v978_v41  ;;  %v705_v50 = vadd.f32 1.0, %v1677_v44  ;;  %vm2427_vm3 = vcmp.lt.f32.partialorder %v981_v42, 0.0004427343 }
  0xd3   :  { %v1681_v52 = vpop.eup %1680  ;;  %v689_v53 = vmul.f32 0.6931472, %v1679_v48  ;;  %1688 = vlog2.f32 %v984_v45  ;;  %v988_v55 = vadd.f32 1.0, %v987_v46  ;;  %vm2431_vm4 = vcmp.lt.f32.partialorder %v990_v47, 0.0004427343 }
  0xd4   :  { %v1683_v56 = vpop.eup %1682  ;;  %v698_v57 = vmul.f32 0.6931472, %v1681_v52  ;;  %1690 = vlog2.f32 %v705_v50  ;;  %v708_v59 = vmul.f32 -0.5, %v1677_v44  ;;  %v980_v61 = vmul.f32 %v1673_v34, %v979_v49  ;;  %v340_v22 = vpop.f32.mrf.mxu2 }
  0xd5   :  { %v695_v60 = vsel %vm2416_vm1, %v692_v35, %v689_v53  ;;  %v711_v62 = vand.u32 2147483647, %v1677_v44  ;;  %v714_v63 = vadd.f32 1.0, %v1683_v56  ;;  %v717_v4 = vmul.f32 -0.5, %v1683_v56  ;;  %v453_v29 = vpop.f32.mrf.mxu3 }
  0xd6   :  { %v1263_v1 = vmul.f32 -1.5, %v695_v60  ;;  %v704_v2 = vsel %vm2422_vm2, %v701_v36, %v698_v57  ;;  %v709_v3 = vadd.f32 1.0, %v708_v59  ;;  %v989_v7 = vmul.f32 %v1675_v39, %v988_v55  ;;  %v295_v30 = vpop.f32.mrf.mxu0 }
  0xd7   :  { %v2441_v5 = vpop.eup %1684  ;;  %v1264_v6 = vmul.f32 -1.5, %v704_v2  ;;  %1692 = vlog2.f32 %v714_v63  ;;  %v720_v8 = vand.u32 2147483647, %v1683_v56  ;;  %vm2443_vm5 = vcmp.lt.f32.partialorder %v711_v62, 0.0004427343  ;;  %v408_v46 = vpop.f32.mrf.mxu1 }
  0xd8   :  { %v1687_v9 = vpop.eup %1686  ;;  %v1327_v10 = vmul.f32 1.442695, %v1263_v1  ;;  %v718_v12 = vadd.f32 1.0, %v717_v4  ;;  %v993_v13 = vadd.f32 1.0, %v2441_v5  ;;  %v710_v17 = vmul.f32 %v1677_v44, %v709_v3 }
  0xd9   :  { %v1689_v14 = vpop.eup %1688  ;;  %v1329_v15 = vmul.f32 1.442695, %v1264_v6  ;;  %v977_v16 = vmul.f32 0.6931472, %v1687_v9  ;;  %1694 = vpow2.f32 %v629_v51  ;;  %vm2448_vm6 = vcmp.lt.f32.partialorder %v720_v8, 0.0004427343 }
  0xda   :  { %v1691_v18 = vpop.eup %1690  ;;  %1696 = vpow2.f32 %v1327_v10  ;;  %v986_v19 = vmul.f32 0.6931472, %v1689_v14  ;;  %v996_v21 = vmul.f32 -0.5, %v2441_v5  ;;  %v719_v25 = vmul.f32 %v1683_v56, %v718_v12 }
  0xdb   :  { %1698 = vpow2.f32 %v1329_v15  ;;  %v983_v23 = vsel %vm2427_vm3, %v980_v61, %v977_v16  ;;  %v707_v24 = vmul.f32 0.6931472, %v1691_v18  ;;  %v999_v35 = vand.u32 2147483647, %v2441_v5 }
  0xdc   :  { %v1295_v26 = vmul.f32 -1.5, %v983_v23  ;;  %v992_v27 = vsel %vm2431_vm4, %v989_v7, %v986_v19  ;;  %1700 = vlog2.f32 %v993_v13  ;;  %v997_v28 = vadd.f32 1.0, %v996_v21  ;;  %v343_v62 = vpop.f32.mrf.mxu2 }
  0xdd   :  { %v1693_v31 = vpop.eup %1692  ;;  %v1296_v32 = vmul.f32 -1.5, %v992_v27  ;;  %v713_v34 = vsel %vm2443_vm5, %v710_v17, %v707_v24  ;;  %v567_v36 = vmul.f32 1.442695, %v499_v43  ;;  %v500_v44 = vsub.f32 0.0, %v2437_v0  ;;  %v456_v8 = vpop.f32.mrf.mxu3 }
  0xde   :  { %v1391_v37 = vmul.f32 1.442695, %v1295_v26  ;;  %v1265_v38 = vmul.f32 -1.5, %v713_v34  ;;  %v716_v39 = vmul.f32 0.6931472, %v1693_v31  ;;  %v998_v40 = vmul.f32 %v2441_v5, %v997_v28  ;;  %v298_v9 = vpop.f32.mrf.mxu0 }
  0xdf   :  { %v1695_v41 = vpop.eup %1694  ;;  %v1393_v42 = vmul.f32 1.442695, %v1296_v32  ;;  %1702 = vpow2.f32 %v567_v36  ;;  %v531_v45 = vsub.f32 0.0, %v340_v22  ;;  %v569_v54 = vmul.f32 1.442695, %v500_v44  ;;  %v2474_v22 = vpop.f32.mrf.mxu1 }
  0xe0   :  { %v1697_v47 = vpop.eup %1696  ;;  %1704 = vpow2.f32 %v1391_v37  ;;  %v1331_v48 = vmul.f32 1.442695, %v1265_v38  ;;  %v722_v49 = vsel %vm2448_vm6, %v719_v25, %v716_v39  ;;  %v1002_v33 = vadd.f32 1.0, %v1695_v41 }
  0xe1   :  { %v1699_v43 = vpop.eup %1698  ;;  %1455 = vst [vmem:[#allocation2] sm:$0xff] %v1697_v47  ;;  %1706 = vpow2.f32 %v1393_v42  ;;  %v1266_v50 = vmul.f32 -1.5, %v722_v49  ;;  %v1005_v51 = vmul.f32 -0.5, %v1695_v41  ;;  %v1008_v52 = vand.u32 2147483647, %v1695_v41 }
  0xe2   :  { %v1701_v53 = vpop.eup %1700  ;;  %1456 = vst [vmem:[#allocation2 + $0x8] sm:$0xff] %v1699_v43  ;;  %1708 = vpow2.f32 %v1331_v48  ;;  %v631_v55 = vmul.f32 1.442695, %v531_v45  ;;  %v532_v56 = vsub.f32 0.0, %v453_v29  ;;  %vm1000_vm7 = vcmp.lt.f32.partialorder %v999_v35, 0.0004427343 }
  0xe3   :  { %v1333_v57 = vmul.f32 1.442695, %v1266_v50  ;;  %v995_v58 = vmul.f32 0.6931472, %v1701_v53  ;;  %1710 = vlog2.f32 %v1002_v33  ;;  %v1006_v59 = vadd.f32 1.0, %v1005_v51 }
  0xe4   :  { %vm2466_vm8 = vcmp.lt.f32.partialorder %v1008_v52, 0.0004427343  ;;  %1712 = vpow2.f32 %v569_v54  ;;  %v501_v61 = vsub.f32 0.0, %v295_v30  ;;  %v633_v1 = vmul.f32 1.442695, %v532_v56 }
  0xe5   :  { %v1703_v63 = vpop.eup %1702  ;;  %1714 = vpow2.f32 %v1333_v57  ;;  %v1001_v0 = vsel %vm1000_vm7, %v998_v40, %v995_v58  ;;  %v502_v2 = vsub.f32 0.0, %v408_v46  ;;  %v1007_v11 = vmul.f32 %v1695_v41, %v1006_v59 }
  0xe6   :  { %v1705_v3 = vpop.eup %1704  ;;  %v1297_v4 = vmul.f32 -1.5, %v1001_v0  ;;  %v723_v5 = vadd.f32 1.0, %v1703_v63  ;;  %v726_v6 = vmul.f32 -0.5, %v1703_v63  ;;  %v729_v7 = vand.u32 2147483647, %v1703_v63 }
  0xe7   :  { %v1707_v10 = vpop.eup %1706  ;;  %1487 = vst [vmem:[#allocation2 + $0x100] sm:$0xff] %v1705_v3  ;;  %1716 = vpow2.f32 %v631_v55  ;;  %v571_v12 = vmul.f32 1.442695, %v501_v61  ;;  %v533_v13 = vsub.f32 0.0, %v343_v62  ;;  %v573_v17 = vmul.f32 1.442695, %v502_v2  ;;  %v2491_v3 = vpop.f32.mrf.mxu2 }
  0xe8   :  { %v1709_v14 = vpop.eup %1708  ;;  %1488 = vst [vmem:[#allocation2 + $0x108] sm:$0xff] %v1707_v10  ;;  %v1395_v15 = vmul.f32 1.442695, %v1297_v4  ;;  %1718 = vlog2.f32 %v723_v5  ;;  %v727_v16 = vadd.f32 1.0, %v726_v6  ;;  %vm2470_vm9 = vcmp.lt.f32.partialorder %v729_v7, 0.0004427343  ;;  %v2509_v19 = vpop.f32.mrf.mxu1 }
  0xe9   :  { %v1711_v18 = vpop.eup %1710  ;;  %1457 = vst [vmem:[#allocation2 + $0x10] sm:$0xff] %v1709_v14  ;;  %1720 = vpow2.f32 %v633_v1  ;;  %v534_v20 = vsub.f32 0.0, %v456_v8  ;;  %v503_v21 = vsub.f32 0.0, %v298_v9  ;;  %v635_v26 = vmul.f32 1.442695, %v533_v13  ;;  %v2501_v13 = vpop.f32.mrf.mxu3 }
  0xea   :  { %v1713_v23 = vpop.eup %1712  ;;  %1722 = vpow2.f32 %v1395_v15  ;;  %v1004_v24 = vmul.f32 0.6931472, %v1711_v18  ;;  %v728_v25 = vmul.f32 %v1703_v63, %v727_v16  ;;  %v504_v34 = vsub.f32 0.0, %v2474_v22  ;;  %v2507_v18 = vpop.f32.mrf.mxu0 }
  0xeb   :  { %v1715_v27 = vpop.eup %1714  ;;  %v732_v28 = vadd.f32 1.0, %v1713_v23  ;;  %v735_v29 = vmul.f32 -0.5, %v1713_v23  ;;  %v738_v30 = vand.u32 2147483647, %v1713_v23  ;;  %1724 = vpow2.f32 %v571_v12 }
  0xec   :  { %1458 = vst [vmem:[#allocation2 + $0x18] sm:$0xff] %v1715_v27  ;;  %v1010_v31 = vsel %vm2466_vm8, %v1007_v11, %v1004_v24  ;;  %1726 = vpow2.f32 %v573_v17  ;;  %v637_v32 = vmul.f32 1.442695, %v534_v20  ;;  %v2479_v38 = vmul.f32 1.442695, %v503_v21 }
  0xed   :  { %v1717_v35 = vpop.eup %1716  ;;  %v1298_v36 = vmul.f32 -1.5, %v1010_v31  ;;  %1728 = vlog2.f32 %v732_v28  ;;  %v736_v37 = vadd.f32 1.0, %v735_v29  ;;  %vm2481_vm10 = vcmp.lt.f32.partialorder %v738_v30, 0.0004427343 }
  0xee   :  { %v1719_v39 = vpop.eup %1718  ;;  %v1011_v40 = vadd.f32 1.0, %v1717_v35  ;;  %v1014_v41 = vmul.f32 -0.5, %v1717_v35  ;;  %v1017_v42 = vand.u32 2147483647, %v1717_v35  ;;  %1730 = vpow2.f32 %v635_v26 }
  0xef   :  { %v1721_v44 = vpop.eup %1720  ;;  %v1397_v45 = vmul.f32 1.442695, %v1298_v36  ;;  %v725_v46 = vmul.f32 0.6931472, %v1719_v39  ;;  %1732 = vpow2.f32 %v637_v32  ;;  %v737_v49 = vmul.f32 %v1713_v23, %v736_v37 }
  0xf0   :  { %v1723_v48 = vpop.eup %1722  ;;  %1734 = vlog2.f32 %v1011_v40  ;;  %v1015_v33 = vadd.f32 1.0, %v1014_v41  ;;  %v1020_v43 = vadd.f32 1.0, %v1721_v44  ;;  %v1023_v52 = vmul.f32 -0.5, %v1721_v44 }
  0xf1   :  { %v1725_v50 = vpop.eup %1724  ;;  %1489 = vst [vmem:[#allocation2 + $0x110] sm:$0xff] %v1723_v48  ;;  %1736 = vpow2.f32 %v1397_v45  ;;  %v731_v51 = vsel %vm2470_vm9, %v728_v25, %v725_v46  ;;  %v1026_v53 = vand.u32 2147483647, %v1721_v44  ;;  %vm2487_vm11 = vcmp.lt.f32.partialorder %v1017_v42, 0.0004427343 }
  0xf2   :  { %v1727_v54 = vpop.eup %1726  ;;  %v1267_v55 = vmul.f32 -1.5, %v731_v51  ;;  %1738 = vlog2.f32 %v1020_v43  ;;  %v741_v57 = vadd.f32 1.0, %v1725_v50  ;;  %v1016_v59 = vmul.f32 %v1717_v35, %v1015_v33  ;;  %v349_v51 = vpop.f32.mrf.mxu2 }
  0xf3   :  { %v1729_v58 = vpop.eup %1728  ;;  %v1024_v60 = vadd.f32 1.0, %v1023_v52  ;;  %v744_v61 = vmul.f32 -0.5, %v1725_v50  ;;  %v747_v62 = vand.u32 2147483647, %v1725_v50  ;;  %v750_v2 = vadd.f32 1.0, %v1727_v54 }
  0xf4   :  { %v1731_v63 = vpop.eup %1730  ;;  %v1335_v0 = vmul.f32 1.442695, %v1267_v55  ;;  %v734_v1 = vmul.f32 0.6931472, %v1729_v58  ;;  %1740 = vlog2.f32 %v741_v57  ;;  %vm2495_vm12 = vcmp.lt.f32.partialorder %v1026_v53, 0.0004427343 }
  0xf5   :  { %v2493_v4 = vpop.eup %1732  ;;  %v1025_v5 = vmul.f32 %v1721_v44, %v1024_v60  ;;  %v745_v7 = vadd.f32 1.0, %v744_v61  ;;  %v753_v8 = vmul.f32 -0.5, %v1727_v54  ;;  %v756_v11 = vand.u32 2147483647, %v1727_v54 }
  0xf6   :  { %v1735_v9 = vpop.eup %1734  ;;  %1742 = vpow2.f32 %v1335_v0  ;;  %v740_v10 = vsel %vm2481_vm10, %v737_v49, %v734_v1  ;;  %v1029_v12 = vadd.f32 1.0, %v1731_v63  ;;  %vm2503_vm13 = vcmp.lt.f32.partialorder %v747_v62, 0.0004427343  ;;  %v304_v0 = vpop.f32.mrf.mxu0 }
  0xf7   :  { %v1737_v14 = vpop.eup %1736  ;;  %v1268_v15 = vmul.f32 -1.5, %v740_v10  ;;  %v1013_v16 = vmul.f32 0.6931472, %v1735_v9  ;;  %1744 = vlog2.f32 %v750_v2  ;;  %v746_v21 = vmul.f32 %v1725_v50, %v745_v7  ;;  %v417_v1 = vpop.f32.mrf.mxu1 }
  0xf8   :  { %v1739_v20 = vpop.eup %1738  ;;  %1490 = vst [vmem:[#allocation2 + $0x118] sm:$0xff] %v1737_v14  ;;  %v754_v23 = vadd.f32 1.0, %v753_v8  ;;  %1746 = vlog2.f32 %v1029_v12  ;;  %v1032_v24 = vmul.f32 -0.5, %v1731_v63  ;;  %v1035_v28 = vand.u32 2147483647, %v1731_v63 }
  0xf9   :  { %v1337_v25 = vmul.f32 1.442695, %v1268_v15  ;;  %v1019_v26 = vsel %vm2487_vm11, %v1016_v59, %v1013_v16  ;;  %v1022_v27 = vmul.f32 0.6931472, %v1739_v20  ;;  %vm2513_vm14 = vcmp.lt.f32.partialorder %v756_v11, 0.0004427343 }
  0xfa   :  { %v1741_v29 = vpop.eup %1740  ;;  %v1299_v30 = vmul.f32 -1.5, %v1019_v26  ;;  %v755_v31 = vmul.f32 %v1727_v54, %v754_v23  ;;  %v1038_v35 = vadd.f32 1.0, %v2493_v4  ;;  %v1033_v39 = vadd.f32 1.0, %v1032_v24 }
  0xfb   :  { %1748 = vpow2.f32 %v1337_v25  ;;  %v1028_v36 = vsel %vm2495_vm12, %v1025_v5, %v1022_v27  ;;  %v743_v37 = vmul.f32 0.6931472, %v1741_v29  ;;  %vm2520_vm15 = vcmp.lt.f32.partialorder %v1035_v28, 0.0004427343  ;;  %v352_v28 = vpop.f32.mrf.mxu2 }
  0xfc   :  { %v1743_v40 = vpop.eup %1742  ;;  %v1399_v41 = vmul.f32 1.442695, %v1299_v30  ;;  %v1300_v42 = vmul.f32 -1.5, %v1028_v36  ;;  %1750 = vlog2.f32 %v1038_v35  ;;  %v1041_v47 = vmul.f32 -0.5, %v2493_v4 }
  0xfd   :  { %v1745_v45 = vpop.eup %1744  ;;  %1459 = vst [vmem:[#allocation2 + $0x20] sm:$0xff] %v1743_v40  ;;  %v749_v46 = vsel %vm2503_vm13, %v746_v21, %v743_v37  ;;  %v1044_v48 = vand.u32 2147483647, %v2493_v4  ;;  %1752 = vpow2.f32 %v2479_v38  ;;  %v1034_v53 = vmul.f32 %v1731_v63, %v1033_v39  ;;  %v462_v38 = vpop.f32.mrf.mxu3 }
  0xfe   :  { %v1747_v49 = vpop.eup %1746  ;;  %1754 = vpow2.f32 %v1399_v41  ;;  %v1401_v33 = vmul.f32 1.442695, %v1300_v42  ;;  %v1269_v43 = vmul.f32 -1.5, %v749_v46  ;;  %v752_v50 = vmul.f32 0.6931472, %v1745_v45  ;;  %v2550_v44 = vpop.f32.mrf.mxu0 }
  0xff   :  { %v1031_v52 = vmul.f32 0.6931472, %v1747_v49  ;;  %v1042_v54 = vadd.f32 1.0, %v1041_v47  ;;  %v535_v55 = vsub.f32 0.0, %v2491_v3  ;;  %v577_v58 = vmul.f32 1.442695, %v504_v34  ;;  %v2552_v45 = vpop.f32.mrf.mxu1 }
 0x100   :  { %1756 = vpow2.f32 %v1401_v33  ;;  %v1339_v56 = vmul.f32 1.442695, %v1269_v43  ;;  %v758_v57 = vsel %vm2513_vm14, %v755_v31, %v752_v50  ;;  %vm2537_vm0 = vcmp.lt.f32.partialorder %v1044_v48, 0.0004427343 }
 0x101   :  { %v1749_v59 = vpop.eup %1748  ;;  %v1270_v60 = vmul.f32 -1.5, %v758_v57  ;;  %v1037_v61 = vsel %vm2520_vm15, %v1034_v53, %v1031_v52  ;;  %v1043_v62 = vmul.f32 %v2493_v4, %v1042_v54  ;;  %v536_v22 = vsub.f32 0.0, %v2501_v13 }
 0x102   :  { %v1751_v2 = vpop.eup %1750  ;;  %1460 = vst [vmem:[#allocation2 + $0x28] sm:$0xff] %v1749_v59  ;;  %1758 = vpow2.f32 %v1339_v56  ;;  %v1301_v3 = vmul.f32 -1.5, %v1037_v61  ;;  %v505_v34 = vsub.f32 0.0, %v2507_v18  ;;  %v639_v8 = vmul.f32 1.442695, %v535_v55 }
 0x103   :  { %v1753_v5 = vpop.eup %1752  ;;  %v1341_v6 = vmul.f32 1.442695, %v1270_v60  ;;  %v1040_v7 = vmul.f32 0.6931472, %v1751_v2  ;;  %1760 = vpow2.f32 %v577_v58  ;;  %v641_v15 = vmul.f32 1.442695, %v536_v22 }
 0x104   :  { %v1755_v4 = vpop.eup %1754  ;;  %v1403_v9 = vmul.f32 1.442695, %v1301_v3  ;;  %v759_v10 = vadd.f32 1.0, %v1753_v5  ;;  %v762_v11 = vmul.f32 -0.5, %v1753_v5  ;;  %v765_v12 = vand.u32 2147483647, %v1753_v5 }
 0x105   :  { %1491 = vst [vmem:[#allocation2 + $0x120] sm:$0xff] %v1755_v4  ;;  %1762 = vpow2.f32 %v1341_v6  ;;  %v1046_v14 = vsel %vm2537_vm0, %v1043_v62, %v1040_v7  ;;  %v506_v13 = vsub.f32 0.0, %v2509_v19  ;;  %v579_v18 = vmul.f32 1.442695, %v505_v34  ;;  %v465_v37 = vpop.f32.mrf.mxu3 }
 0x106   :  { %v1757_v16 = vpop.eup %1756  ;;  %1764 = vpow2.f32 %v1403_v9  ;;  %v1302_v17 = vmul.f32 -1.5, %v1046_v14  ;;  %v763_v20 = vadd.f32 1.0, %v762_v11  ;;  %v537_v21 = vsub.f32 0.0, %v349_v51 }
 0x107   :  { %1492 = vst [vmem:[#allocation2 + $0x128] sm:$0xff] %v1757_v16  ;;  %1766 = vlog2.f32 %v759_v10  ;;  %v538_v23 = vsub.f32 0.0, %v462_v38  ;;  %vm2546_vm1 = vcmp.lt.f32.partialorder %v765_v12, 0.0004427343  ;;  %v507_v27 = vsub.f32 0.0, %v304_v0 }
 0x108   :  { %v1759_v24 = vpop.eup %1758  ;;  %v1405_v25 = vmul.f32 1.442695, %v1302_v17  ;;  %1768 = vpow2.f32 %v639_v8  ;;  %v581_v19 = vmul.f32 1.442695, %v506_v13  ;;  %v643_v30 = vmul.f32 1.442695, %v537_v21 }
 0x109   :  { %v1761_v29 = vpop.eup %1760  ;;  %1461 = vst [vmem:[#allocation2 + $0x30] sm:$0xff] %v1759_v24  ;;  %1770 = vpow2.f32 %v641_v15  ;;  %v508_v31 = vsub.f32 0.0, %v417_v1  ;;  %v764_v40 = vmul.f32 %v1753_v5, %v763_v20  ;;  %v645_v41 = vmul.f32 1.442695, %v538_v23  ;;  %v2608_v5 = vpop.f32.mrf.mxu0 }
 0x10a   :  { %1772 = vpow2.f32 %v1405_v25  ;;  %v768_v32 = vadd.f32 1.0, %v1761_v29  ;;  %v771_v35 = vmul.f32 -0.5, %v1761_v29  ;;  %v774_v36 = vand.u32 2147483647, %v1761_v29 }
 0x10b   :  { %v1763_v39 = vpop.eup %1762  ;;  %1774 = vpow2.f32 %v579_v18  ;;  %v539_v42 = vsub.f32 0.0, %v352_v28  ;;  %v583_v48 = vmul.f32 1.442695, %v507_v27  ;;  %v2554_v49 = vmul.f32 1.442695, %v508_v31 }
 0x10c   :  { %v1765_v46 = vpop.eup %1764  ;;  %1462 = vst [vmem:[#allocation2 + $0x38] sm:$0xff] %v1763_v39  ;;  %1776 = vlog2.f32 %v768_v32  ;;  %v772_v47 = vadd.f32 1.0, %v771_v35  ;;  %vm2556_vm2 = vcmp.lt.f32.partialorder %v774_v36, 0.0004427343  ;;  %v540_v51 = vsub.f32 0.0, %v465_v37 }
 0x10d   :  { %v1767_v33 = vpop.eup %1766  ;;  %1493 = vst [vmem:[#allocation2 + $0x130] sm:$0xff] %v1765_v46  ;;  %1778 = vpow2.f32 %v581_v19  ;;  %v2560_v50 = vmul.f32 1.442695, %v539_v42  ;;  %v509_v54 = vsub.f32 0.0, %v2550_v44  ;;  %v510_v55 = vsub.f32 0.0, %v2552_v45 }
 0x10e   :  { %v1769_v52 = vpop.eup %1768  ;;  %v761_v53 = vmul.f32 0.6931472, %v1767_v33  ;;  %1780 = vpow2.f32 %v643_v30  ;;  %v773_v2 = vmul.f32 %v1761_v29, %v772_v47  ;;  %v2566_v3 = vmul.f32 1.442695, %v540_v51 }
 0x10f   :  { %v1771_v56 = vpop.eup %1770  ;;  %v1047_v57 = vadd.f32 1.0, %v1769_v52  ;;  %v1050_v58 = vmul.f32 -0.5, %v1769_v52  ;;  %v1053_v38 = vand.u32 2147483647, %v1769_v52  ;;  %1782 = vpow2.f32 %v645_v41 }
 0x110   :  { %v1773_v59 = vpop.eup %1772  ;;  %v767_v60 = vsel %vm2546_vm1, %v764_v40, %v761_v53  ;;  %v1056_v61 = vadd.f32 1.0, %v1771_v56  ;;  %v1059_v62 = vmul.f32 -0.5, %v1771_v56  ;;  %v1062_v63 = vand.u32 2147483647, %v1771_v56 }
 0x111   :  { %v1775_v0 = vpop.eup %1774  ;;  %1494 = vst [vmem:[#allocation2 + $0x138] sm:$0xff] %v1773_v59  ;;  %v1271_v1 = vmul.f32 -1.5, %v767_v60  ;;  %1784 = vlog2.f32 %v1047_v57  ;;  %v1051_v34 = vadd.f32 1.0, %v1050_v58  ;;  %vm2568_vm3 = vcmp.lt.f32.partialorder %v1053_v38, 0.0004427343  ;;  %v2602_v59 = vpop.f32.mrf.mxu2 }
 0x112   :  { %v1777_v22 = vpop.eup %1776  ;;  %1786 = vlog2.f32 %v1056_v61  ;;  %v777_v6 = vadd.f32 1.0, %v1775_v0  ;;  %v1060_v9 = vadd.f32 1.0, %v1059_v62  ;;  %v780_v10 = vmul.f32 -0.5, %v1775_v0 }
 0x113   :  { %v1779_v7 = vpop.eup %1778  ;;  %v1343_v8 = vmul.f32 1.442695, %v1271_v1  ;;  %v770_v4 = vmul.f32 0.6931472, %v1777_v22  ;;  %vm2574_vm4 = vcmp.lt.f32.partialorder %v1062_v63, 0.0004427343  ;;  %v1052_v21 = vmul.f32 %v1769_v52, %v1051_v34 }
 0x114   :  { %v2572_v11 = vpop.eup %1780  ;;  %1788 = vlog2.f32 %v777_v6  ;;  %v783_v14 = vand.u32 2147483647, %v1775_v0  ;;  %v786_v15 = vadd.f32 1.0, %v1779_v7  ;;  %v781_v17 = vadd.f32 1.0, %v780_v10  ;;  %v2610_v10 = vpop.f32.mrf.mxu1 }
 0x115   :  { %v2578_v13 = vpop.eup %1782  ;;  %1790 = vpow2.f32 %v1343_v8  ;;  %v776_v16 = vsel %vm2556_vm2, %v773_v2, %v770_v4  ;;  %v789_v18 = vmul.f32 -0.5, %v1779_v7  ;;  %v792_v23 = vand.u32 2147483647, %v1779_v7 }
 0x116   :  { %v1272_v20 = vmul.f32 -1.5, %v776_v16  ;;  %1792 = vlog2.f32 %v786_v15  ;;  %v1061_v25 = vmul.f32 %v1771_v56, %v1060_v9  ;;  %v1065_v27 = vadd.f32 1.0, %v2572_v11 }
 0x117   :  { %v1785_v24 = vpop.eup %1784  ;;  %v790_v26 = vadd.f32 1.0, %v789_v18  ;;  %v1068_v28 = vmul.f32 -0.5, %v2572_v11  ;;  %vm2584_vm5 = vcmp.lt.f32.partialorder %v783_v14, 0.0004427343  ;;  %1794 = vpow2.f32 %v583_v48 }
 0x118   :  { %v1787_v29 = vpop.eup %1786  ;;  %v1345_v19 = vmul.f32 1.442695, %v1272_v20  ;;  %v1049_v30 = vmul.f32 0.6931472, %v1785_v24  ;;  %v782_v35 = vmul.f32 %v1775_v0, %v781_v17  ;;  %1796 = vlog2.f32 %v1065_v27  ;;  %v468_v0 = vpop.f32.mrf.mxu3 }
 0x119   :  { %v1058_v32 = vmul.f32 0.6931472, %v1787_v29  ;;  %v1069_v36 = vadd.f32 1.0, %v1068_v28  ;;  %vm2590_vm6 = vcmp.lt.f32.partialorder %v792_v23, 0.0004427343  ;;  %v1074_v41 = vadd.f32 1.0, %v2578_v13 }
 0x11a   :  { %v1789_v37 = vpop.eup %1788  ;;  %1798 = vpow2.f32 %v1345_v19  ;;  %v1055_v39 = vsel %vm2568_vm3, %v1052_v21, %v1049_v30  ;;  %v791_v33 = vmul.f32 %v1779_v7, %v790_v26  ;;  %v1071_v52 = vand.u32 2147483647, %v2572_v11 }
 0x11b   :  { %v1791_v42 = vpop.eup %1790  ;;  %v1303_v46 = vmul.f32 -1.5, %v1055_v39  ;;  %v1064_v47 = vsel %vm2574_vm4, %v1061_v25, %v1058_v32  ;;  %v779_v48 = vmul.f32 0.6931472, %v1789_v37  ;;  %1800 = vlog2.f32 %v1074_v41  ;;  %v358_v37 = vpop.f32.mrf.mxu2 }
 0x11c   :  { %v1793_v43 = vpop.eup %1792  ;;  %1463 = vst [vmem:[#allocation2 + $0x40] sm:$0xff] %v1791_v42  ;;  %v1304_v51 = vmul.f32 -1.5, %v1064_v47  ;;  %v1077_v53 = vmul.f32 -0.5, %v2578_v13  ;;  %v1070_v38 = vmul.f32 %v2572_v11, %v1069_v36  ;;  %v1080_v63 = vand.u32 2147483647, %v2578_v13 }
 0x11d   :  { %v1407_v56 = vmul.f32 1.442695, %v1303_v46  ;;  %v785_v57 = vsel %vm2584_vm5, %v782_v35, %v779_v48  ;;  %v788_v58 = vmul.f32 0.6931472, %v1793_v43  ;;  %v1795_v60 = vpop.eup %1794  ;;  %1802 = vpow2.f32 %v2554_v49 }
 0x11e   :  { %v1409_v61 = vmul.f32 1.442695, %v1304_v51  ;;  %v1273_v62 = vmul.f32 -1.5, %v785_v57  ;;  %v1797_v1 = vpop.eup %1796  ;;  %v1078_v22 = vadd.f32 1.0, %v1077_v53  ;;  %v795_v34 = vadd.f32 1.0, %v1795_v60 }
 0x11f   :  { %1804 = vpow2.f32 %v1407_v56  ;;  %v794_v2 = vsel %vm2590_vm6, %v791_v33, %v788_v58  ;;  %v1067_v4 = vmul.f32 0.6931472, %v1797_v1  ;;  %vm1072_vm7 = vcmp.lt.f32.partialorder %v1071_v52, 0.0004427343 }
 0x120   :  { %v1799_v6 = vpop.eup %1798  ;;  %1806 = vpow2.f32 %v1409_v61  ;;  %v1347_v7 = vmul.f32 1.442695, %v1273_v62  ;;  %v1274_v8 = vmul.f32 -1.5, %v794_v2  ;;  %v798_v9 = vmul.f32 -0.5, %v1795_v60  ;;  %v471_v46 = vpop.f32.mrf.mxu3 }
 0x121   :  { %1464 = vst [vmem:[#allocation2 + $0x48] sm:$0xff] %v1799_v6  ;;  %1808 = vlog2.f32 %v795_v34  ;;  %v801_v49 = vand.u32 2147483647, %v1795_v60  ;;  %v1801_v11 = vpop.eup %1800  ;;  %v1073_v14 = vsel %vm1072_vm7, %v1070_v38, %v1067_v4  ;;  %vm2612_vm8 = vcmp.lt.f32.partialorder %v1080_v63, 0.0004427343 }
 0x122   :  { %1810 = vpow2.f32 %v1347_v7  ;;  %v1349_v12 = vmul.f32 1.442695, %v1274_v8  ;;  %v1305_v16 = vmul.f32 -1.5, %v1073_v14  ;;  %v1076_v17 = vmul.f32 0.6931472, %v1801_v11 }
 0x123   :  { %v1079_v18 = vmul.f32 %v2578_v13, %v1078_v22  ;;  %v799_v20 = vadd.f32 1.0, %v798_v9  ;;  %v1803_v21 = vpop.eup %1802  ;;  %vm2617_vm9 = vcmp.lt.f32.partialorder %v801_v49, 0.0004427343  ;;  %v587_v24 = vmul.f32 1.442695, %v509_v54 }
 0x124   :  { %1812 = vpow2.f32 %v1349_v12  ;;  %v541_v25 = vsub.f32 0.0, %v2602_v59  ;;  %v1411_v27 = vmul.f32 1.442695, %v1305_v16  ;;  %v804_v29 = vadd.f32 1.0, %v1803_v21 }
 0x125   :  { %v1805_v26 = vpop.eup %1804  ;;  %v1082_v28 = vsel %vm2612_vm8, %v1079_v18, %v1076_v17  ;;  %v542_v19 = vsub.f32 0.0, %v468_v0  ;;  %v807_v31 = vmul.f32 -0.5, %v1803_v21  ;;  %1814 = vpow2.f32 %v2560_v50 }
 0x126   :  { %v1807_v13 = vpop.eup %1806  ;;  %1495 = vst [vmem:[#allocation2 + $0x140] sm:$0xff] %v1805_v26  ;;  %v1306_v30 = vmul.f32 -1.5, %v1082_v28  ;;  %v589_v32 = vmul.f32 1.442695, %v510_v55  ;;  %1816 = vpow2.f32 %v1411_v27  ;;  %v800_v54 = vmul.f32 %v1795_v60, %v799_v20  ;;  %v313_v55 = vpop.f32.mrf.mxu0 }
 0x127   :  { %v1809_v44 = vpop.eup %1808  ;;  %1496 = vst [vmem:[#allocation2 + $0x148] sm:$0xff] %v1807_v13  ;;  %v810_v35 = vand.u32 2147483647, %v1803_v21  ;;  %v511_v36 = vsub.f32 0.0, %v2608_v5  ;;  %1818 = vlog2.f32 %v804_v29  ;;  %v808_v42 = vadd.f32 1.0, %v807_v31 }
 0x128   :  { %v1811_v39 = vpop.eup %1810  ;;  %v1413_v40 = vmul.f32 1.442695, %v1306_v30  ;;  %v797_v41 = vmul.f32 0.6931472, %v1809_v44  ;;  %1820 = vpow2.f32 %v2566_v3  ;;  %v651_v50 = vmul.f32 1.442695, %v541_v25  ;;  %v426_v3 = vpop.f32.mrf.mxu1 }
 0x129   :  { %1465 = vst [vmem:[#allocation2 + $0x50] sm:$0xff] %v1811_v39  ;;  %v653_v45 = vmul.f32 1.442695, %v542_v19  ;;  %v512_v33 = vsub.f32 0.0, %v2610_v10  ;;  %v543_v43 = vsub.f32 0.0, %v358_v37  ;;  %v544_v53 = vsub.f32 0.0, %v471_v46 }
 0x12a   :  { %v1813_v47 = vpop.eup %1812  ;;  %1822 = vpow2.f32 %v1413_v40  ;;  %v803_v48 = vsel %vm2617_vm9, %v800_v54, %v797_v41  ;;  %vm2634_vm10 = vcmp.lt.f32.partialorder %v810_v35, 0.0004427343  ;;  %v809_v57 = vmul.f32 %v1803_v21, %v808_v42 }
 0x12b   :  { %1466 = vst [vmem:[#allocation2 + $0x58] sm:$0xff] %v1813_v47  ;;  %v1275_v51 = vmul.f32 -1.5, %v803_v48  ;;  %1824 = vpow2.f32 %v587_v24  ;;  %v1815_v56 = vpop.eup %1814  ;;  %v2638_v58 = vmul.f32 1.442695, %v511_v36  ;;  %v513_v38 = vsub.f32 0.0, %v313_v55 }
 0x12c   :  { %1826 = vpow2.f32 %v589_v32  ;;  %v1817_v59 = vpop.eup %1816  ;;  %v1083_v61 = vadd.f32 1.0, %v1815_v56  ;;  %v1086_v62 = vmul.f32 -0.5, %v1815_v56  ;;  %v1089_v63 = vand.u32 2147483647, %v1815_v56 }
 0x12d   :  { %v1351_v60 = vmul.f32 1.442695, %v1275_v51  ;;  %v1819_v0 = vpop.eup %1818  ;;  %1497 = vst [vmem:[#allocation2 + $0x150] sm:$0xff] %v1817_v59  ;;  %1828 = vpow2.f32 %v651_v50  ;;  %v2640_v1 = vmul.f32 1.442695, %v512_v33  ;;  %v514_v22 = vsub.f32 0.0, %v426_v3 }
 0x12e   :  { %v2642_v2 = vmul.f32 1.442695, %v543_v43  ;;  %v1821_v34 = vpop.eup %1820  ;;  %v806_v5 = vmul.f32 0.6931472, %v1819_v0  ;;  %v2644_v6 = vmul.f32 1.442695, %v544_v53 }
 0x12f   :  { %1830 = vpow2.f32 %v1351_v60  ;;  %v2646_v7 = vmul.f32 1.442695, %v513_v38  ;;  %v1087_v4 = vadd.f32 1.0, %v1086_v62  ;;  %v1092_v9 = vadd.f32 1.0, %v1821_v34 }
 0x130   :  { %v1823_v8 = vpop.eup %1822  ;;  %1832 = vlog2.f32 %v1083_v61  ;;  %v1095_v49 = vmul.f32 -0.5, %v1821_v34  ;;  %v812_v11 = vsel %vm2634_vm10, %v809_v57, %v806_v5  ;;  %vm2650_vm11 = vcmp.lt.f32.partialorder %v1089_v63, 0.0004427343  ;;  %v429_v13 = vpop.f32.mrf.mxu1 }
 0x131   :  { %v1825_v10 = vpop.eup %1824  ;;  %1498 = vst [vmem:[#allocation2 + $0x158] sm:$0xff] %v1823_v8  ;;  %v1098_v14 = vand.u32 2147483647, %v1821_v34  ;;  %1834 = vpow2.f32 %v653_v45  ;;  %v1276_v16 = vmul.f32 -1.5, %v812_v11  ;;  %v2654_v18 = vmul.f32 1.442695, %v514_v22  ;;  %v361_v45 = vpop.f32.mrf.mxu2 }
 0x132   :  { %v1827_v15 = vpop.eup %1826  ;;  %1836 = vlog2.f32 %v1092_v9  ;;  %v1096_v17 = vadd.f32 1.0, %v1095_v49  ;;  %v813_v20 = vadd.f32 1.0, %v1825_v10  ;;  %v816_v21 = vmul.f32 -0.5, %v1825_v10 }
 0x133   :  { %v819_v23 = vand.u32 2147483647, %v1825_v10  ;;  %v822_v24 = vadd.f32 1.0, %v1827_v15  ;;  %v1829_v25 = vpop.eup %1828  ;;  %v1353_v26 = vmul.f32 1.442695, %v1276_v16  ;;  %v1088_v27 = vmul.f32 %v1815_v56, %v1087_v4 }
 0x134   :  { %v825_v28 = vmul.f32 -0.5, %v1827_v15  ;;  %v828_v29 = vand.u32 2147483647, %v1827_v15  ;;  %vm2656_vm12 = vcmp.lt.f32.partialorder %v1098_v14, 0.0004427343  ;;  %1838 = vlog2.f32 %v813_v20 }
 0x135   :  { %v1831_v19 = vpop.eup %1830  ;;  %v817_v30 = vadd.f32 1.0, %v816_v21  ;;  %v1101_v31 = vadd.f32 1.0, %v1829_v25  ;;  %1840 = vpow2.f32 %v1353_v26  ;;  %v1097_v44 = vmul.f32 %v1821_v34, %v1096_v17  ;;  %v2679_v34 = vpop.f32.mrf.mxu3 }
 0x136   :  { %v1833_v32 = vpop.eup %1832  ;;  %1467 = vst [vmem:[#allocation2 + $0x60] sm:$0xff] %v1831_v19  ;;  %v826_v54 = vadd.f32 1.0, %v825_v28  ;;  %v1104_v35 = vmul.f32 -0.5, %v1829_v25  ;;  %vm2660_vm13 = vcmp.lt.f32.partialorder %v819_v23, 0.0004427343  ;;  %1842 = vlog2.f32 %v822_v24  ;;  %v316_v21 = vpop.f32.mrf.mxu0 }
 0x137   :  { %v1835_v36 = vpop.eup %1834  ;;  %v1085_v37 = vmul.f32 0.6931472, %v1833_v32  ;;  %vm2664_vm14 = vcmp.lt.f32.partialorder %v828_v29, 0.0004427343  ;;  %v818_v42 = vmul.f32 %v1825_v10, %v817_v30  ;;  %1844 = vlog2.f32 %v1101_v31 }
 0x138   :  { %v1837_v41 = vpop.eup %1836  ;;  %v1107_v46 = vand.u32 2147483647, %v1829_v25  ;;  %v1110_v50 = vadd.f32 1.0, %v1835_v36  ;;  %v1105_v48 = vadd.f32 1.0, %v1104_v35  ;;  %v1113_v33 = vmul.f32 -0.5, %v1835_v36 }
 0x139   :  { %v1091_v55 = vsel %vm2650_vm11, %v1088_v27, %v1085_v37  ;;  %v1094_v47 = vmul.f32 0.6931472, %v1837_v41  ;;  %v827_v51 = vmul.f32 %v1827_v15, %v826_v54  ;;  %v1116_v52 = vand.u32 2147483647, %v1835_v36 }
 0x13a   :  { %v1307_v43 = vmul.f32 -1.5, %v1091_v55  ;;  %1846 = vlog2.f32 %v1110_v50  ;;  %v1839_v53 = vpop.eup %1838  ;;  %v1114_v56 = vadd.f32 1.0, %v1113_v33  ;;  %v545_v57 = vsub.f32 0.0, %v361_v45 }
 0x13b   :  { %v1100_v3 = vsel %vm2656_vm12, %v1097_v44, %v1094_v47  ;;  %1848 = vpow2.f32 %v2638_v58  ;;  %v1841_v38 = vpop.eup %1840  ;;  %v815_v61 = vmul.f32 0.6931472, %v1839_v53  ;;  %v1106_v63 = vmul.f32 %v1829_v25, %v1105_v48 }
 0x13c   :  { %v1415_v59 = vmul.f32 1.442695, %v1307_v43  ;;  %v1308_v60 = vmul.f32 -1.5, %v1100_v3  ;;  %1850 = vpow2.f32 %v2640_v1  ;;  %v1843_v62 = vpop.eup %1842  ;;  %1468 = vst [vmem:[#allocation2 + $0x68] sm:$0xff] %v1841_v38  ;;  %vm2674_vm15 = vcmp.lt.f32.partialorder %v1107_v46, 0.0004427343  ;;  %v364_v38 = vpop.f32.mrf.mxu2 }
 0x13d   :  { %v1115_v22 = vmul.f32 %v1835_v36, %v1114_v56  ;;  %1852 = vpow2.f32 %v2642_v2  ;;  %v1845_v58 = vpop.eup %1844  ;;  %v821_v8 = vsel %vm2660_vm13, %v818_v42, %v815_v61  ;;  %v824_v4 = vmul.f32 0.6931472, %v1843_v62 }
 0x13e   :  { %1854 = vpow2.f32 %v1415_v59  ;;  %v1417_v5 = vmul.f32 1.442695, %v1308_v60  ;;  %v1277_v1 = vmul.f32 -1.5, %v821_v8  ;;  %v1103_v9 = vmul.f32 0.6931472, %v1845_v58  ;;  %v477_v59 = vpop.f32.mrf.mxu3 }
 0x13f   :  { %vm2683_vm0 = vcmp.lt.f32.partialorder %v1116_v52, 0.0004427343  ;;  %1856 = vpow2.f32 %v2644_v6  ;;  %v830_v2 = vsel %vm2664_vm14, %v827_v51, %v824_v4  ;;  %v2690_v11 = vmul.f32 1.442695, %v545_v57 }
 0x140   :  { %v1847_v10 = vpop.eup %1846  ;;  %1858 = vpow2.f32 %v1417_v5  ;;  %v546_v12 = vsub.f32 0.0, %v2679_v34  ;;  %v1355_v15 = vmul.f32 1.442695, %v1277_v1  ;;  %v1278_v16 = vmul.f32 -1.5, %v830_v2  ;;  %v319_v5 = vpop.f32.mrf.mxu0 }
 0x141   :  { %v1849_v14 = vpop.eup %1848  ;;  %v1109_v17 = vsel %vm2674_vm15, %v1106_v63, %v1103_v9  ;;  %v1112_v20 = vmul.f32 0.6931472, %v1847_v10  ;;  %v515_v44 = vsub.f32 0.0, %v316_v21  ;;  %v516_v42 = vsub.f32 0.0, %v429_v13 }
 0x142   :  { %v1851_v23 = vpop.eup %1850  ;;  %v1309_v24 = vmul.f32 -1.5, %v1109_v17  ;;  %v831_v6 = vadd.f32 1.0, %v1849_v14  ;;  %v834_v25 = vmul.f32 -0.5, %v1849_v14  ;;  %v837_v26 = vand.u32 2147483647, %v1849_v14 }
 0x143   :  { %v1853_v27 = vpop.eup %1852  ;;  %1860 = vpow2.f32 %v1355_v15  ;;  %v1357_v28 = vmul.f32 1.442695, %v1278_v16  ;;  %v1118_v29 = vsel %vm2683_vm0, %v1115_v22, %v1112_v20  ;;  %v840_v19 = vadd.f32 1.0, %v1851_v23 }
 0x144   :  { %v1855_v30 = vpop.eup %1854  ;;  %v1419_v31 = vmul.f32 1.442695, %v1309_v24  ;;  %v1310_v32 = vmul.f32 -1.5, %v1118_v29  ;;  %1862 = vlog2.f32 %v831_v6  ;;  %v835_v35 = vadd.f32 1.0, %v834_v25 }
 0x145   :  { %v1857_v54 = vpop.eup %1856  ;;  %1499 = vst [vmem:[#allocation2 + $0x160] sm:$0xff] %v1855_v30  ;;  %1864 = vpow2.f32 %v1357_v28  ;;  %v843_v36 = vmul.f32 -0.5, %v1851_v23  ;;  %v846_v37 = vand.u32 2147483647, %v1851_v23  ;;  %v1119_v41 = vadd.f32 1.0, %v1853_v27 }
 0x146   :  { %v1859_v39 = vpop.eup %1858  ;;  %1866 = vpow2.f32 %v1419_v31  ;;  %v1421_v40 = vmul.f32 1.442695, %v1310_v32  ;;  %vm2697_vm1 = vcmp.lt.f32.partialorder %v837_v26, 0.0004427343  ;;  %v1122_v45 = vmul.f32 -0.5, %v1853_v27 }
 0x147   :  { %1500 = vst [vmem:[#allocation2 + $0x168] sm:$0xff] %v1859_v39  ;;  %1868 = vlog2.f32 %v840_v19  ;;  %v844_v50 = vadd.f32 1.0, %v843_v36  ;;  %v1125_v55 = vand.u32 2147483647, %v1853_v27  ;;  %v1128_v47 = vadd.f32 1.0, %v1857_v54 }
 0x148   :  { %1870 = vpow2.f32 %v1421_v40  ;;  %v1131_v48 = vmul.f32 -0.5, %v1857_v54  ;;  %v836_v43 = vmul.f32 %v1849_v14, %v835_v35  ;;  %vm2701_vm2 = vcmp.lt.f32.partialorder %v846_v37, 0.0004427343 }
 0x149   :  { %v1861_v33 = vpop.eup %1860  ;;  %1872 = vlog2.f32 %v1119_v41  ;;  %v1123_v52 = vadd.f32 1.0, %v1122_v45  ;;  %v845_v3 = vmul.f32 %v1851_v23, %v844_v50  ;;  %v1134_v56 = vand.u32 2147483647, %v1857_v54 }
 0x14a   :  { %v1863_v53 = vpop.eup %1862  ;;  %1469 = vst [vmem:[#allocation2 + $0x70] sm:$0xff] %v1861_v33  ;;  %1874 = vlog2.f32 %v1128_v47  ;;  %v661_v57 = vmul.f32 1.442695, %v546_v12  ;;  %vm2705_vm3 = vcmp.lt.f32.partialorder %v1125_v55, 0.0004427343  ;;  %v1132_v63 = vadd.f32 1.0, %v1131_v48 }
 0x14b   :  { %v1865_v60 = vpop.eup %1864  ;;  %v833_v61 = vmul.f32 0.6931472, %v1863_v53  ;;  %1876 = vpow2.f32 %v2646_v7  ;;  %v1124_v22 = vmul.f32 %v1853_v27, %v1123_v52  ;;  %v599_v34 = vmul.f32 1.442695, %v515_v44 }
 0x14c   :  { %v1867_v0 = vpop.eup %1866  ;;  %1470 = vst [vmem:[#allocation2 + $0x78] sm:$0xff] %v1865_v60  ;;  %1878 = vpow2.f32 %v2654_v18  ;;  %v601_v58 = vmul.f32 1.442695, %v516_v42  ;;  %v547_v1 = vsub.f32 0.0, %v364_v38  ;;  %v548_v9 = vsub.f32 0.0, %v477_v59  ;;  %v2718_v18 = vpop.f32.mrf.mxu1 }
 0x14d   :  { %v1869_v8 = vpop.eup %1868  ;;  %1501 = vst [vmem:[#allocation2 + $0x170] sm:$0xff] %v1867_v0  ;;  %v839_v4 = vsel %vm2697_vm1, %v836_v43, %v833_v61  ;;  %1880 = vpow2.f32 %v2690_v11  ;;  %vm2714_vm4 = vcmp.lt.f32.partialorder %v1134_v56, 0.0004427343  ;;  %v1133_v14 = vmul.f32 %v1857_v54, %v1132_v63 }
 0x14e   :  { %v1871_v49 = vpop.eup %1870  ;;  %v1279_v10 = vmul.f32 -1.5, %v839_v4  ;;  %v842_v7 = vmul.f32 0.6931472, %v1869_v8  ;;  %1882 = vpow2.f32 %v661_v57  ;;  %v663_v15 = vmul.f32 1.442695, %v547_v1 }
 0x14f   :  { %v1873_v12 = vpop.eup %1872  ;;  %1502 = vst [vmem:[#allocation2 + $0x178] sm:$0xff] %v1871_v49  ;;  %1884 = vpow2.f32 %v599_v34  ;;  %v517_v16 = vsub.f32 0.0, %v319_v5  ;;  %v2722_v23 = vmul.f32 1.442695, %v548_v9  ;;  %v518_v26 = vsub.f32 0.0, %v2718_v18 }
 0x150   :  { %v1875_v17 = vpop.eup %1874  ;;  %v1359_v11 = vmul.f32 1.442695, %v1279_v10  ;;  %v848_v20 = vsel %vm2701_vm2, %v845_v3, %v842_v7  ;;  %v1121_v21 = vmul.f32 0.6931472, %v1873_v12  ;;  %1886 = vpow2.f32 %v601_v58 }
 0x151   :  { %v1877_v24 = vpop.eup %1876  ;;  %v1280_v6 = vmul.f32 -1.5, %v848_v20  ;;  %v1130_v25 = vmul.f32 0.6931472, %v1875_v17  ;;  %v2731_v50 = vmul.f32 1.442695, %v517_v16 }
 0x152   :  { %v1879_v27 = vpop.eup %1878  ;;  %1888 = vpow2.f32 %v1359_v11  ;;  %v1127_v28 = vsel %vm2705_vm3, %v1124_v22, %v1121_v21  ;;  %v849_v29 = vadd.f32 1.0, %v1877_v24  ;;  %v852_v19 = vmul.f32 -0.5, %v1877_v24 }
 0x153   :  { %v1881_v13 = vpop.eup %1880  ;;  %v1361_v30 = vmul.f32 1.442695, %v1280_v6  ;;  %v1311_v31 = vmul.f32 -1.5, %v1127_v28  ;;  %v1136_v32 = vsel %vm2714_vm4, %v1133_v14, %v1130_v25  ;;  %1890 = vpow2.f32 %v663_v15 }
 0x154   :  { %v1883_v44 = vpop.eup %1882  ;;  %v1312_v54 = vmul.f32 -1.5, %v1136_v32  ;;  %1892 = vlog2.f32 %v849_v29  ;;  %v855_v35 = vand.u32 2147483647, %v1877_v24  ;;  %v858_v36 = vadd.f32 1.0, %v1879_v27 }
 0x155   :  { %v2729_v37 = vpop.eup %1884  ;;  %1894 = vpow2.f32 %v1361_v30  ;;  %v1423_v39 = vmul.f32 1.442695, %v1311_v31  ;;  %v853_v40 = vadd.f32 1.0, %v852_v19  ;;  %v861_v41 = vmul.f32 -0.5, %v1879_v27  ;;  %v367_v30 = vpop.f32.mrf.mxu2 }
 0x156   :  { %v1425_v42 = vmul.f32 1.442695, %v1312_v54  ;;  %1896 = vlog2.f32 %v858_v36  ;;  %v864_v46 = vand.u32 2147483647, %v1879_v27  ;;  %v2733_v45 = vpop.eup %1886  ;;  %v1137_v47 = vadd.f32 1.0, %v1881_v13 }
 0x157   :  { %1898 = vpow2.f32 %v1423_v39  ;;  %v862_v55 = vadd.f32 1.0, %v861_v41  ;;  %v1140_v48 = vmul.f32 -0.5, %v1881_v13  ;;  %vm2735_vm5 = vcmp.lt.f32.partialorder %v855_v35, 0.0004427343  ;;  %v480_v41 = vpop.f32.mrf.mxu3 }
 0x158   :  { %v1889_v33 = vpop.eup %1888  ;;  %1900 = vpow2.f32 %v1425_v42  ;;  %v1143_v51 = vand.u32 2147483647, %v1881_v13  ;;  %v1146_v52 = vadd.f32 1.0, %v1883_v44  ;;  %v854_v3 = vmul.f32 %v1877_v24, %v853_v40 }
 0x159   :  { %v2739_v53 = vpop.eup %1890  ;;  %1471 = vst [vmem:[#allocation2 + $0x80] sm:$0xff] %v1889_v33  ;;  %1902 = vlog2.f32 %v1137_v47  ;;  %v1141_v56 = vadd.f32 1.0, %v1140_v48  ;;  %v1149_v57 = vmul.f32 -0.5, %v1883_v44  ;;  %vm2741_vm6 = vcmp.lt.f32.partialorder %v864_v46, 0.0004427343  ;;  %v322_v48 = vpop.f32.mrf.mxu0 }
 0x15a   :  { %v1893_v38 = vpop.eup %1892  ;;  %1904 = vlog2.f32 %v1146_v52  ;;  %v1152_v60 = vand.u32 2147483647, %v1883_v44  ;;  %v867_v61 = vadd.f32 1.0, %v2729_v37  ;;  %v863_v0 = vmul.f32 %v1879_v27, %v862_v55 }
 0x15b   :  { %v1895_v62 = vpop.eup %1894  ;;  %v851_v63 = vmul.f32 0.6931472, %v1893_v38  ;;  %v1150_v22 = vadd.f32 1.0, %v1149_v57  ;;  %v870_v34 = vmul.f32 -0.5, %v2729_v37  ;;  %v1142_v5 = vmul.f32 %v1881_v13, %v1141_v56 }
 0x15c   :  { %v1897_v58 = vpop.eup %1896  ;;  %1472 = vst [vmem:[#allocation2 + $0x88] sm:$0xff] %v1895_v62  ;;  %vm2747_vm7 = vcmp.lt.f32.partialorder %v1143_v51, 0.0004427343  ;;  %1906 = vlog2.f32 %v867_v61  ;;  %v876_v4 = vadd.f32 1.0, %v2733_v45  ;;  %vm2754_vm8 = vcmp.lt.f32.partialorder %v1152_v60, 0.0004427343 }
 0x15d   :  { %v1899_v1 = vpop.eup %1898  ;;  %v857_v9 = vsel %vm2735_vm5, %v854_v3, %v851_v63  ;;  %v860_v49 = vmul.f32 0.6931472, %v1897_v58  ;;  %v873_v7 = vand.u32 2147483647, %v2729_v37  ;;  %v871_v14 = vadd.f32 1.0, %v870_v34 }
 0x15e   :  { %v1901_v2 = vpop.eup %1900  ;;  %1503 = vst [vmem:[#allocation2 + $0x180] sm:$0xff] %v1899_v1  ;;  %v1281_v12 = vmul.f32 -1.5, %v857_v9  ;;  %1908 = vlog2.f32 %v876_v4  ;;  %v879_v15 = vmul.f32 -0.5, %v2733_v45  ;;  %v1151_v11 = vmul.f32 %v1883_v44, %v1150_v22 }
 0x15f   :  { %v1903_v16 = vpop.eup %1902  ;;  %1504 = vst [vmem:[#allocation2 + $0x188] sm:$0xff] %v1901_v2  ;;  %v866_v17 = vsel %vm2741_vm6, %v863_v0, %v860_v49  ;;  %v882_v20 = vand.u32 2147483647, %v2733_v45  ;;  %v1155_v21 = vadd.f32 1.0, %v2739_v53  ;;  %vm2764_vm9 = vcmp.lt.f32.partialorder %v873_v7, 0.0004427343  ;;  %v483_v7 = vpop.f32.mrf.mxu3 }
 0x160   :  { %v1905_v24 = vpop.eup %1904  ;;  %v1363_v6 = vmul.f32 1.442695, %v1281_v12  ;;  %v1282_v25 = vmul.f32 -1.5, %v866_v17  ;;  %v1139_v27 = vmul.f32 0.6931472, %v1903_v16  ;;  %v880_v28 = vadd.f32 1.0, %v879_v15 }
 0x161   :  { %v1148_v29 = vmul.f32 0.6931472, %v1905_v24  ;;  %1910 = vlog2.f32 %v1155_v21  ;;  %v1158_v13 = vmul.f32 -0.5, %v2739_v53  ;;  %v872_v54 = vmul.f32 %v2729_v37, %v871_v14  ;;  %v325_v14 = vpop.f32.mrf.mxu0 }
 0x162   :  { %v1907_v31 = vpop.eup %1906  ;;  %1912 = vpow2.f32 %v1363_v6  ;;  %v1365_v32 = vmul.f32 1.442695, %v1282_v25  ;;  %v1145_v44 = vsel %vm2747_vm7, %v1142_v5, %v1139_v27  ;;  %v881_v55 = vmul.f32 %v2733_v45, %v880_v28  ;;  %v435_v45 = vpop.f32.mrf.mxu1 }
 0x163   :  { %v1313_v35 = vmul.f32 -1.5, %v1145_v44  ;;  %v1154_v36 = vsel %vm2754_vm8, %v1151_v11, %v1148_v29  ;;  %v869_v39 = vmul.f32 0.6931472, %v1907_v31  ;;  %v1159_v40 = vadd.f32 1.0, %v1158_v13  ;;  %v370_v5 = vpop.f32.mrf.mxu2 }
 0x164   :  { %v1909_v42 = vpop.eup %1908  ;;  %1914 = vpow2.f32 %v1365_v32  ;;  %v1314_v46 = vmul.f32 -1.5, %v1154_v36  ;;  %vm2775_vm10 = vcmp.lt.f32.partialorder %v882_v20, 0.0004427343  ;;  %v1161_v51 = vand.u32 2147483647, %v2739_v53 }
 0x165   :  { %v1427_v33 = vmul.f32 1.442695, %v1313_v35  ;;  %v875_v37 = vsel %vm2764_vm9, %v872_v54, %v869_v39  ;;  %v878_v43 = vmul.f32 0.6931472, %v1909_v42  ;;  %1916 = vpow2.f32 %v2722_v23 }
 0x166   :  { %v1429_v52 = vmul.f32 1.442695, %v1314_v46  ;;  %v1283_v3 = vmul.f32 -1.5, %v875_v37  ;;  %v605_v56 = vmul.f32 1.442695, %v518_v26  ;;  %v1160_v59 = vmul.f32 %v2739_v53, %v1159_v40 }
 0x167   :  { %v1911_v57 = vpop.eup %1910  ;;  %1918 = vpow2.f32 %v1427_v33  ;;  %v884_v38 = vsel %vm2775_vm10, %v881_v55, %v878_v43  ;;  %v549_v60 = vsub.f32 0.0, %v367_v30  ;;  %vm1162_vm11 = vcmp.lt.f32.partialorder %v1161_v51, 0.0004427343 }
 0x168   :  { %v1913_v61 = vpop.eup %1912  ;;  %1920 = vpow2.f32 %v1429_v52  ;;  %v1367_v62 = vmul.f32 1.442695, %v1283_v3  ;;  %v1284_v63 = vmul.f32 -1.5, %v884_v38  ;;  %v1157_v0 = vmul.f32 0.6931472, %v1911_v57 }
 0x169   :  { %1473 = vst [vmem:[#allocation2 + $0x90] sm:$0xff] %v1913_v61  ;;  %1922 = vpow2.f32 %v2731_v50  ;;  %v550_v18 = vsub.f32 0.0, %v480_v41  ;;  %v667_v34 = vmul.f32 1.442695, %v549_v60  ;;  %v519_v53 = vsub.f32 0.0, %v322_v48 }
 0x16a   :  { %v1915_v23 = vpop.eup %1914  ;;  %1924 = vpow2.f32 %v1367_v62  ;;  %v1369_v26 = vmul.f32 1.442695, %v1284_v63  ;;  %v1163_v22 = vsel %vm1162_vm11, %v1160_v59, %v1157_v0  ;;  %v520_v10 = vsub.f32 0.0, %v435_v45  ;;  %v438_v24 = vpop.f32.mrf.mxu1 }
 0x16b   :  { %1474 = vst [vmem:[#allocation2 + $0x98] sm:$0xff] %v1915_v23  ;;  %v1315_v58 = vmul.f32 -1.5, %v1163_v22  ;;  %1926 = vpow2.f32 %v605_v56  ;;  %v1917_v8 = vpop.eup %1916  ;;  %v669_v49 = vmul.f32 1.442695, %v550_v18  ;;  %v551_v12 = vsub.f32 0.0, %v370_v5 }
 0x16c   :  { %1928 = vpow2.f32 %v1369_v26  ;;  %v1164_v9 = vadd.f32 1.0, %v1917_v8  ;;  %v1167_v2 = vmul.f32 -0.5, %v1917_v8  ;;  %v607_v16 = vmul.f32 1.442695, %v519_v53 }
 0x16d   :  { %v1919_v4 = vpop.eup %1918  ;;  %v1431_v1 = vmul.f32 1.442695, %v1315_v58  ;;  %1930 = vpow2.f32 %v667_v34  ;;  %v552_v21 = vsub.f32 0.0, %v483_v7  ;;  %v1170_v25 = vand.u32 2147483647, %v1917_v8 }
 0x16e   :  { %v1921_v50 = vpop.eup %1920  ;;  %1505 = vst [vmem:[#allocation2 + $0x190] sm:$0xff] %v1919_v4  ;;  %v609_v27 = vmul.f32 1.442695, %v520_v10  ;;  %v521_v28 = vsub.f32 0.0, %v325_v14  ;;  %v1168_v19 = vadd.f32 1.0, %v1167_v2  ;;  %v522_v44 = vsub.f32 0.0, %v438_v24  ;;  %v373_v2 = vpop.f32.mrf.mxu2 }
 0x16f   :  { %v1923_v15 = vpop.eup %1922  ;;  %1506 = vst [vmem:[#allocation2 + $0x198] sm:$0xff] %v1921_v50  ;;  %1932 = vpow2.f32 %v1431_v1  ;;  %v671_v30 = vmul.f32 1.442695, %v551_v12  ;;  %v2789_v39 = vmul.f32 1.442695, %v552_v21 }
 0x170   :  { %v1925_v17 = vpop.eup %1924  ;;  %1934 = vlog2.f32 %v1164_v9  ;;  %v885_v11 = vadd.f32 1.0, %v1923_v15  ;;  %v888_v20 = vmul.f32 -0.5, %v1923_v15  ;;  %v891_v31 = vand.u32 2147483647, %v1923_v15 }
 0x171   :  { %v1927_v6 = vpop.eup %1926  ;;  %1475 = vst [vmem:[#allocation2 + $0xa0] sm:$0xff] %v1925_v17  ;;  %1936 = vpow2.f32 %v669_v49  ;;  %vm2791_vm12 = vcmp.lt.f32.partialorder %v1170_v25, 0.0004427343  ;;  %v2795_v55 = vmul.f32 1.442695, %v521_v28  ;;  %v1169_v48 = vmul.f32 %v1917_v8, %v1168_v19 }
 0x172   :  { %v1929_v29 = vpop.eup %1928  ;;  %1938 = vlog2.f32 %v885_v11  ;;  %v894_v13 = vadd.f32 1.0, %v1927_v6  ;;  %v897_v32 = vmul.f32 -0.5, %v1927_v6  ;;  %v889_v35 = vadd.f32 1.0, %v888_v20 }
 0x173   :  { %1476 = vst [vmem:[#allocation2 + $0xa8] sm:$0xff] %v1929_v29  ;;  %1940 = vpow2.f32 %v607_v16  ;;  %v1931_v54 = vpop.eup %1930  ;;  %v900_v36 = vand.u32 2147483647, %v1927_v6  ;;  %vm2797_vm13 = vcmp.lt.f32.partialorder %v891_v31, 0.0004427343  ;;  %v553_v31 = vsub.f32 0.0, %v373_v2 }
 0x174   :  { %1942 = vlog2.f32 %v894_v13  ;;  %v1173_v42 = vadd.f32 1.0, %v1931_v54  ;;  %v1176_v46 = vmul.f32 -0.5, %v1931_v54  ;;  %v898_v33 = vadd.f32 1.0, %v897_v32  ;;  %v486_v13 = vpop.f32.mrf.mxu3  ;;  %v328_v32 = vpop.f32.mrf.mxu0 }
 0x175   :  { %v1933_v40 = vpop.eup %1932  ;;  %v1179_v37 = vand.u32 2147483647, %v1931_v54  ;;  %1944 = vpow2.f32 %v609_v27  ;;  %v2801_v3 = vmul.f32 1.442695, %v522_v44  ;;  %v890_v45 = vmul.f32 %v1923_v15, %v889_v35 }
 0x176   :  { %v1935_v47 = vpop.eup %1934  ;;  %1507 = vst [vmem:[#allocation2 + $0x1a0] sm:$0xff] %v1933_v40  ;;  %1946 = vlog2.f32 %v1173_v42  ;;  %vm2803_vm14 = vcmp.lt.f32.partialorder %v900_v36, 0.0004427343  ;;  %v1177_v63 = vadd.f32 1.0, %v1176_v46  ;;  %v899_v23 = vmul.f32 %v1927_v6, %v898_v33  ;;  %v441_v40 = vpop.f32.mrf.mxu1 }
 0x177   :  { %v1937_v43 = vpop.eup %1936  ;;  %v1166_v51 = vmul.f32 0.6931472, %v1935_v47  ;;  %1948 = vpow2.f32 %v671_v30  ;;  %vm2811_vm15 = vcmp.lt.f32.partialorder %v1179_v37, 0.0004427343 }
 0x178   :  { %v1939_v56 = vpop.eup %1938  ;;  %v1182_v38 = vadd.f32 1.0, %v1937_v43  ;;  %v1185_v59 = vmul.f32 -0.5, %v1937_v43  ;;  %v1188_v1 = vand.u32 2147483647, %v1937_v43  ;;  %v1178_v7 = vmul.f32 %v1931_v54, %v1177_v63 }
 0x179   :  { %v2807_v60 = vpop.eup %1940  ;;  %v1172_v61 = vsel %vm2791_vm12, %v1169_v48, %v1166_v51  ;;  %v887_v62 = vmul.f32 0.6931472, %v1939_v56  ;;  %v554_v48 = vsub.f32 0.0, %v486_v13  ;;  %v675_v63 = vmul.f32 1.442695, %v553_v31 }
 0x17a   :  { %v1943_v0 = vpop.eup %1942  ;;  %v1316_v18 = vmul.f32 -1.5, %v1172_v61  ;;  %1950 = vlog2.f32 %v1182_v38  ;;  %v1186_v58 = vadd.f32 1.0, %v1185_v59  ;;  %v903_v53 = vadd.f32 1.0, %v2807_v60 }
 0x17b   :  { %v893_v22 = vsel %vm2797_vm13, %v890_v45, %v887_v62  ;;  %v896_v34 = vmul.f32 0.6931472, %v1943_v0  ;;  %v1945_v5 = vpop.eup %1944  ;;  %v906_v9 = vmul.f32 -0.5, %v2807_v60  ;;  %v909_v11 = vand.u32 2147483647, %v2807_v60 }
 0x17c   :  { %v1433_v8 = vmul.f32 1.442695, %v1316_v18  ;;  %v1285_v4 = vmul.f32 -1.5, %v893_v22  ;;  %v1947_v49 = vpop.eup %1946  ;;  %1952 = vlog2.f32 %v903_v53  ;;  %v912_v50 = vadd.f32 1.0, %v1945_v5 }
 0x17d   :  { %v902_v10 = vsel %vm2803_vm14, %v899_v23, %v896_v34  ;;  %v1175_v15 = vmul.f32 0.6931472, %v1947_v49  ;;  %v2821_v16 = vpop.eup %1948  ;;  %v1187_v17 = vmul.f32 %v1937_v43, %v1186_v58  ;;  %v915_v20 = vmul.f32 -0.5, %v1945_v5 }
 0x17e   :  { %1954 = vpow2.f32 %v1433_v8  ;;  %v1371_v12 = vmul.f32 1.442695, %v1285_v4  ;;  %v1286_v14 = vmul.f32 -1.5, %v902_v10  ;;  %v907_v25 = vadd.f32 1.0, %v906_v9  ;;  %v2834_v9 = vpop.f32.mrf.mxu0 }
 0x17f   :  { %1956 = vlog2.f32 %v912_v50  ;;  %v1181_v6 = vsel %vm2811_vm15, %v1178_v7, %v1175_v15  ;;  %v916_v29 = vadd.f32 1.0, %v915_v20  ;;  %v1191_v19 = vadd.f32 1.0, %v2821_v16  ;;  %v2836_v7 = vpop.f32.mrf.mxu1 }
 0x180   :  { %v1951_v21 = vpop.eup %1950  ;;  %1958 = vpow2.f32 %v1371_v12  ;;  %v1373_v24 = vmul.f32 1.442695, %v1286_v14  ;;  %v1317_v27 = vmul.f32 -1.5, %v1181_v6  ;;  %vm1189_vm0 = vcmp.lt.f32.partialorder %v1188_v1, 0.0004427343  ;;  %v489_v1 = vpop.f32.mrf.mxu3 }
 0x181   :  { %v1184_v28 = vmul.f32 0.6931472, %v1951_v21  ;;  %v1194_v30 = vmul.f32 -0.5, %v2821_v16  ;;  %v918_v36 = vand.u32 2147483647, %v1945_v5  ;;  %v908_v47 = vmul.f32 %v2807_v60, %v907_v25  ;;  %v376_v60 = vpop.f32.mrf.mxu2 }
 0x182   :  { %1960 = vpow2.f32 %v1373_v24  ;;  %v1953_v44 = vpop.eup %1952  ;;  %v1435_v54 = vmul.f32 1.442695, %v1317_v27  ;;  %vm910_vm1 = vcmp.lt.f32.partialorder %v909_v11, 0.0004427343  ;;  %v917_v37 = vmul.f32 %v1945_v5, %v916_v29 }
 0x183   :  { %v1190_v35 = vsel %vm1189_vm0, %v1187_v17, %v1184_v28  ;;  %1962 = vlog2.f32 %v1191_v19  ;;  %v905_v46 = vmul.f32 0.6931472, %v1953_v44  ;;  %v523_v43 = vsub.f32 0.0, %v328_v32 }
 0x184   :  { %v1955_v41 = vpop.eup %1954  ;;  %v1318_v42 = vmul.f32 -1.5, %v1190_v35  ;;  %1964 = vpow2.f32 %v1435_v54  ;;  %v1195_v57 = vadd.f32 1.0, %v1194_v30  ;;  %vm919_vm2 = vcmp.lt.f32.partialorder %v918_v36, 0.0004427343 }
 0x185   :  { %v1957_v33 = vpop.eup %1956  ;;  %1508 = vst [vmem:[#allocation2 + $0x1a8] sm:$0xff] %v1955_v41  ;;  %v911_v56 = vsel %vm910_vm1, %v908_v47, %v905_v46  ;;  %v1197_v59 = vand.u32 2147483647, %v2821_v16  ;;  %1966 = vpow2.f32 %v2789_v39  ;;  %v677_v0 = vmul.f32 1.442695, %v554_v48 }
 0x186   :  { %v1959_v51 = vpop.eup %1958  ;;  %v1437_v52 = vmul.f32 1.442695, %v1318_v42  ;;  %v914_v45 = vmul.f32 0.6931472, %v1957_v33  ;;  %v1287_v38 = vmul.f32 -1.5, %v911_v56  ;;  %v524_v22 = vsub.f32 0.0, %v441_v40 }
 0x187   :  { %1477 = vst [vmem:[#allocation2 + $0xb0] sm:$0xff] %v1959_v51  ;;  %v1196_v58 = vmul.f32 %v2821_v16, %v1195_v57  ;;  %v555_v53 = vsub.f32 0.0, %v376_v60  ;;  %vm1198_vm3 = vcmp.lt.f32.partialorder %v1197_v59, 0.0004427343  ;;  %v615_v8 = vmul.f32 1.442695, %v523_v43 }
 0x188   :  { %v1961_v61 = vpop.eup %1960  ;;  %1968 = vpow2.f32 %v1437_v52  ;;  %v920_v62 = vsel %vm919_vm2, %v917_v37, %v914_v45  ;;  %v1375_v23 = vmul.f32 1.442695, %v1287_v38  ;;  %v617_v10 = vmul.f32 1.442695, %v524_v22 }
 0x189   :  { %v1963_v18 = vpop.eup %1962  ;;  %1478 = vst [vmem:[#allocation2 + $0xb8] sm:$0xff] %v1961_v61  ;;  %v1288_v26 = vmul.f32 -1.5, %v920_v62  ;;  %1970 = vpow2.f32 %v2795_v55  ;;  %v2838_v12 = vmul.f32 1.442695, %v555_v53  ;;  %v556_v16 = vsub.f32 0.0, %v489_v1 }
 0x18a   :  { %v1193_v34 = vmul.f32 0.6931472, %v1963_v18  ;;  %1972 = vpow2.f32 %v2801_v3  ;;  %v1965_v39 = vpop.eup %1964  ;;  %v525_v17 = vsub.f32 0.0, %v2834_v9  ;;  %v526_v24 = vsub.f32 0.0, %v2836_v7 }
 0x18b   :  { %1974 = vpow2.f32 %v1375_v23  ;;  %v1377_v5 = vmul.f32 1.442695, %v1288_v26  ;;  %1509 = vst [vmem:[#allocation2 + $0x1b0] sm:$0xff] %v1965_v39  ;;  %v1967_v49 = vpop.eup %1966  ;;  %v2842_v54 = vmul.f32 1.442695, %v556_v16 }
 0x18c   :  { %v1199_v4 = vsel %vm1198_vm3, %v1196_v58, %v1193_v34  ;;  %1976 = vpow2.f32 %v675_v63  ;;  %v1200_v3 = vadd.f32 1.0, %v1967_v49  ;;  %v1203_v2 = vmul.f32 -0.5, %v1967_v49 }
 0x18d   :  { %1978 = vpow2.f32 %v1377_v5  ;;  %v1319_v55 = vmul.f32 -1.5, %v1199_v4  ;;  %v1206_v20 = vand.u32 2147483647, %v1967_v49 }
 0x18e   :  { %v1969_v50 = vpop.eup %1968  ;;  %1980 = vpow2.f32 %v677_v0  ;;  %v1204_v25 = vadd.f32 1.0, %v1203_v2 }
 0x18f   :  { %v1971_v14 = vpop.eup %1970  ;;  %1510 = vst [vmem:[#allocation2 + $0x1b8] sm:$0xff] %v1969_v50  ;;  %v1439_v15 = vmul.f32 1.442695, %v1319_v55  ;;  %1982 = vpow2.f32 %v615_v8  ;;  %vm2844_vm4 = vcmp.lt.f32.partialorder %v1206_v20, 0.0004427343 }
 0x190   :  { %v1973_v11 = vpop.eup %1972  ;;  %1984 = vlog2.f32 %v1200_v3  ;;  %v921_v21 = vadd.f32 1.0, %v1971_v14  ;;  %v924_v27 = vmul.f32 -0.5, %v1971_v14  ;;  %v927_v19 = vand.u32 2147483647, %v1971_v14 }
 0x191   :  { %v1975_v6 = vpop.eup %1974  ;;  %1986 = vpow2.f32 %v1439_v15  ;;  %v930_v28 = vadd.f32 1.0, %v1973_v11  ;;  %v933_v13 = vmul.f32 -0.5, %v1973_v11  ;;  %v936_v30 = vand.u32 2147483647, %v1973_v11 }
 0x192   :  { %v1977_v29 = vpop.eup %1976  ;;  %1479 = vst [vmem:[#allocation2 + $0xc0] sm:$0xff] %v1975_v6  ;;  %1988 = vlog2.f32 %v921_v21  ;;  %v925_v32 = vadd.f32 1.0, %v924_v27  ;;  %v1205_v46 = vmul.f32 %v1967_v49, %v1204_v25  ;;  %vm2848_vm5 = vcmp.lt.f32.partialorder %v927_v19, 0.0004427343  ;;  %v379_v19 = vpop.f32.mrf.mxu2 }
 0x193   :  { %v1979_v31 = vpop.eup %1978  ;;  %1990 = vlog2.f32 %v930_v28  ;;  %v1209_v44 = vadd.f32 1.0, %v1977_v29  ;;  %v934_v40 = vadd.f32 1.0, %v933_v13  ;;  %v1212_v41 = vmul.f32 -0.5, %v1977_v29 }
 0x194   :  { %v1981_v35 = vpop.eup %1980  ;;  %1480 = vst [vmem:[#allocation2 + $0xc8] sm:$0xff] %v1979_v31  ;;  %1992 = vpow2.f32 %v617_v10  ;;  %v1215_v47 = vand.u32 2147483647, %v1977_v29  ;;  %vm2852_vm6 = vcmp.lt.f32.partialorder %v936_v30, 0.0004427343  ;;  %v926_v57 = vmul.f32 %v1971_v14, %v925_v32 }
 0x195   :  { %v1983_v42 = vpop.eup %1982  ;;  %1994 = vlog2.f32 %v1209_v44  ;;  %v1218_v48 = vadd.f32 1.0, %v1981_v35  ;;  %v1213_v51 = vadd.f32 1.0, %v1212_v41  ;;  %v1221_v52 = vmul.f32 -0.5, %v1981_v35 }
 0x196   :  { %v1985_v33 = vpop.eup %1984  ;;  %v939_v38 = vadd.f32 1.0, %v1983_v42  ;;  %v935_v60 = vmul.f32 %v1973_v11, %v934_v40  ;;  %vm2856_vm7 = vcmp.lt.f32.partialorder %v1215_v47, 0.0004427343  ;;  %v1224_v62 = vand.u32 2147483647, %v1981_v35 }
 0x197   :  { %v1987_v56 = vpop.eup %1986  ;;  %v1202_v45 = vmul.f32 0.6931472, %v1985_v33  ;;  %1996 = vlog2.f32 %v1218_v48  ;;  %v942_v63 = vmul.f32 -0.5, %v1983_v42  ;;  %v1222_v26 = vadd.f32 1.0, %v1221_v52  ;;  %v492_v48 = vpop.f32.mrf.mxu3 }
 0x198   :  { %v1989_v59 = vpop.eup %1988  ;;  %1511 = vst [vmem:[#allocation2 + $0x1c0] sm:$0xff] %v1987_v56  ;;  %1998 = vlog2.f32 %v939_v38  ;;  %v1214_v53 = vmul.f32 %v1977_v29, %v1213_v51  ;;  %v945_v39 = vand.u32 2147483647, %v1983_v42  ;;  %vm2866_vm8 = vcmp.lt.f32.partialorder %v1224_v62, 0.0004427343 }
 0x199   :  { %v1991_v0 = vpop.eup %1990  ;;  %v1208_v18 = vsel %vm2844_vm4, %v1205_v46, %v1202_v45  ;;  %v923_v23 = vmul.f32 0.6931472, %v1989_v59  ;;  %v943_v4 = vadd.f32 1.0, %v942_v63  ;;  %v1223_v15 = vmul.f32 %v1981_v35, %v1222_v26 }
 0x19a   :  { %v1993_v22 = vpop.eup %1992  ;;  %v1320_v34 = vmul.f32 -1.5, %v1208_v18  ;;  %v932_v58 = vmul.f32 0.6931472, %v1991_v0  ;;  %vm2872_vm9 = vcmp.lt.f32.partialorder %v945_v39, 0.0004427343  ;;  %v557_v41 = vsub.f32 0.0, %v379_v19 }
 0x19b   :  { %v1995_v5 = vpop.eup %1994  ;;  %v929_v8 = vsel %vm2848_vm5, %v926_v57, %v923_v23  ;;  %v948_v1 = vadd.f32 1.0, %v1993_v22  ;;  %v951_v49 = vmul.f32 -0.5, %v1993_v22  ;;  %v944_v28 = vmul.f32 %v1983_v42, %v943_v4 }
 0x19c   :  { %v1441_v55 = vmul.f32 1.442695, %v1320_v34  ;;  %v1289_v10 = vmul.f32 -1.5, %v929_v8  ;;  %v938_v50 = vsel %vm2852_vm6, %v935_v60, %v932_v58  ;;  %v1211_v3 = vmul.f32 0.6931472, %v1995_v5 }
 0x19d   :  { %v1997_v2 = vpop.eup %1996  ;;  %v1290_v14 = vmul.f32 -1.5, %v938_v50  ;;  %2000 = vlog2.f32 %v948_v1  ;;  %v952_v31 = vadd.f32 1.0, %v951_v49  ;;  %v954_v35 = vand.u32 2147483647, %v1993_v22 }
 0x19e   :  { %2002 = vpow2.f32 %v1441_v55  ;;  %v1379_v11 = vmul.f32 1.442695, %v1289_v10  ;;  %v1217_v20 = vsel %vm2856_vm7, %v1214_v53, %v1211_v3  ;;  %v1220_v21 = vmul.f32 0.6931472, %v1997_v2  ;;  %v1999_v6 = vpop.eup %1998 }
 0x19f   :  { %v1381_v25 = vmul.f32 1.442695, %v1290_v14  ;;  %v1321_v27 = vmul.f32 -1.5, %v1217_v20  ;;  %v941_v30 = vmul.f32 0.6931472, %v1999_v6  ;;  %v953_v43 = vmul.f32 %v1993_v22, %v952_v31 }
 0x1a0   :  { %2004 = vpow2.f32 %v1379_v11  ;;  %v1226_v13 = vsel %vm2866_vm8, %v1223_v15, %v1220_v21  ;;  %v619_v40 = vmul.f32 1.442695, %v525_v17  ;;  %v621_v51 = vmul.f32 1.442695, %v526_v24 }
 0x1a1   :  { %2006 = vpow2.f32 %v1381_v25  ;;  %v1443_v32 = vmul.f32 1.442695, %v1321_v27  ;;  %v1322_v44 = vmul.f32 -1.5, %v1226_v13  ;;  %v947_v36 = vsel %vm2872_vm9, %v944_v28, %v941_v30 }
 0x1a2   :  { %2008 = vpow2.f32 %v2838_v12  ;;  %v1291_v47 = vmul.f32 -1.5, %v947_v36  ;;  %vm955_vm10 = vcmp.lt.f32.partialorder %v954_v35, 0.0004427343  ;;  %v683_v52 = vmul.f32 1.442695, %v557_v41 }
 0x1a3   :  { %v2001_v42 = vpop.eup %2000  ;;  %2010 = vpow2.f32 %v1443_v32  ;;  %v1445_v46 = vmul.f32 1.442695, %v1322_v44  ;;  %v558_v56 = vsub.f32 0.0, %v492_v48 }
 0x1a4   :  { %v2003_v33 = vpop.eup %2002  ;;  %v950_v37 = vmul.f32 0.6931472, %v2001_v42  ;;  %2012 = vpow2.f32 %v2842_v54  ;;  %v1383_v12 = vmul.f32 1.442695, %v1291_v47 }
 0x1a5   :  { %1512 = vst [vmem:[#allocation2 + $0x1c8] sm:$0xff] %v2003_v33  ;;  %2014 = vpow2.f32 %v1445_v46  ;;  %v685_v61 = vmul.f32 1.442695, %v558_v56 }
 0x1a6   :  { %v2005_v9 = vpop.eup %2004  ;;  %v956_v17 = vsel %vm955_vm10, %v953_v43, %v950_v37  ;;  %2016 = vpow2.f32 %v619_v40 }
 0x1a7   :  { %v2007_v45 = vpop.eup %2006  ;;  %1481 = vst [vmem:[#allocation2 + $0xd0] sm:$0xff] %v2005_v9  ;;  %2018 = vpow2.f32 %v1383_v12  ;;  %v1292_v57 = vmul.f32 -1.5, %v956_v17 }
 0x1a8   :  { %v2009_v38 = vpop.eup %2008  ;;  %1482 = vst [vmem:[#allocation2 + $0xd8] sm:$0xff] %v2007_v45  ;;  %2020 = vpow2.f32 %v621_v51 }
 0x1a9   :  { %v2011_v54 = vpop.eup %2010  ;;  %v1385_v59 = vmul.f32 1.442695, %v1292_v57  ;;  %v1227_v7 = vadd.f32 1.0, %v2009_v38  ;;  %v1230_v60 = vmul.f32 -0.5, %v2009_v38  ;;  %2022 = vpow2.f32 %v683_v52 }
 0x1aa   :  { %v2013_v24 = vpop.eup %2012  ;;  %1513 = vst [vmem:[#allocation2 + $0x1d0] sm:$0xff] %v2011_v54  ;;  %v1233_v53 = vand.u32 2147483647, %v2009_v38 }
 0x1ab   :  { %v2015_v62 = vpop.eup %2014  ;;  %2024 = vpow2.f32 %v1385_v59  ;;  %v1236_v63 = vadd.f32 1.0, %v2013_v24  ;;  %v1239_v18 = vmul.f32 -0.5, %v2013_v24  ;;  %v1231_v58 = vadd.f32 1.0, %v1230_v60 }
 0x1ac   :  { %v2017_v0 = vpop.eup %2016  ;;  %1514 = vst [vmem:[#allocation2 + $0x1d8] sm:$0xff] %v2015_v62  ;;  %2026 = vlog2.f32 %v1227_v7  ;;  %v1242_v39 = vand.u32 2147483647, %v2013_v24  ;;  %vm2886_vm11 = vcmp.lt.f32.partialorder %v1233_v53, 0.0004427343 }
 0x1ad   :  { %v2019_v23 = vpop.eup %2018  ;;  %2028 = vlog2.f32 %v1236_v63  ;;  %v957_v26 = vadd.f32 1.0, %v2017_v0  ;;  %v960_v22 = vmul.f32 -0.5, %v2017_v0  ;;  %v1240_v4 = vadd.f32 1.0, %v1239_v18 }
 0x1ae   :  { %v2021_v34 = vpop.eup %2020  ;;  %1483 = vst [vmem:[#allocation2 + $0xe0] sm:$0xff] %v2019_v23  ;;  %2030 = vpow2.f32 %v685_v61  ;;  %v1232_v3 = vmul.f32 %v2009_v38, %v1231_v58  ;;  %vm2890_vm12 = vcmp.lt.f32.partialorder %v1242_v39, 0.0004427343  ;;  %v963_v20 = vand.u32 2147483647, %v2017_v0 }
 0x1af   :  { %2032 = vlog2.f32 %v957_v26  ;;  %v966_v5 = vadd.f32 1.0, %v2021_v34  ;;  %v2023_v8 = vpop.eup %2022  ;;  %v961_v1 = vadd.f32 1.0, %v960_v22  ;;  %v969_v49 = vmul.f32 -0.5, %v2021_v34 }
 0x1b0   :  { %v1245_v10 = vadd.f32 1.0, %v2023_v8  ;;  %v1248_v15 = vmul.f32 -0.5, %v2023_v8  ;;  %v972_v21 = vand.u32 2147483647, %v2021_v34  ;;  %v1241_v27 = vmul.f32 %v2013_v24, %v1240_v4 }
 0x1b1   :  { %v2025_v55 = vpop.eup %2024  ;;  %2034 = vlog2.f32 %v966_v5  ;;  %v962_v28 = vmul.f32 %v2017_v0, %v961_v1  ;;  %v970_v29 = vadd.f32 1.0, %v969_v49  ;;  %v1251_v31 = vand.u32 2147483647, %v2023_v8 }
 0x1b2   :  { %v2027_v50 = vpop.eup %2026  ;;  %1484 = vst [vmem:[#allocation2 + $0xe8] sm:$0xff] %v2025_v55  ;;  %2036 = vlog2.f32 %v1245_v10  ;;  %v1249_v30 = vadd.f32 1.0, %v1248_v15  ;;  %vm964_vm13 = vcmp.lt.f32.partialorder %v963_v20, 0.0004427343  ;;  %vm2898_vm14 = vcmp.lt.f32.partialorder %v972_v21, 0.0004427343 }
 0x1b3   :  { %v2029_v16 = vpop.eup %2028  ;;  %v1229_v11 = vmul.f32 0.6931472, %v2027_v50  ;;  %v971_v37 = vmul.f32 %v2021_v34, %v970_v29  ;;  %vm1252_vm15 = vcmp.lt.f32.partialorder %v1251_v31, 0.0004427343 }
 0x1b4   :  { %v2031_v6 = vpop.eup %2030  ;;  %v1238_v25 = vmul.f32 0.6931472, %v2029_v16  ;;  %v1250_v9 = vmul.f32 %v2023_v8, %v1249_v30 }
 0x1b5   :  { %v2033_v19 = vpop.eup %2032  ;;  %v1235_v13 = vsel %vm2886_vm11, %v1232_v3, %v1229_v11  ;;  %v1254_v32 = vadd.f32 1.0, %v2031_v6  ;;  %v1257_v40 = vmul.f32 -0.5, %v2031_v6  ;;  %v1260_v38 = vand.u32 2147483647, %v2031_v6 }
 0x1b6   :  { %v1323_v44 = vmul.f32 -1.5, %v1235_v13  ;;  %v1244_v35 = vsel %vm2890_vm12, %v1241_v27, %v1238_v25  ;;  %v959_v36 = vmul.f32 0.6931472, %v2033_v19 }
 0x1b7   :  { %v2035_v41 = vpop.eup %2034  ;;  %v1324_v42 = vmul.f32 -1.5, %v1244_v35  ;;  %2038 = vlog2.f32 %v1254_v32  ;;  %v1258_v56 = vadd.f32 1.0, %v1257_v40  ;;  %vm1261_vm0 = vcmp.lt.f32.partialorder %v1260_v38, 0.0004427343 }
 0x1b8   :  { %v1447_v47 = vmul.f32 1.442695, %v1323_v44  ;;  %v965_v48 = vsel %vm964_vm13, %v962_v28, %v959_v36  ;;  %v968_v33 = vmul.f32 0.6931472, %v2035_v41  ;;  %v2037_v43 = vpop.eup %2036 }
 0x1b9   :  { %v1449_v51 = vmul.f32 1.442695, %v1324_v42  ;;  %v1293_v12 = vmul.f32 -1.5, %v965_v48  ;;  %v1247_v52 = vmul.f32 0.6931472, %v2037_v43  ;;  %v1259_v61 = vmul.f32 %v2031_v6, %v1258_v56 }
 0x1ba   :  { %2040 = vpow2.f32 %v1447_v47  ;;  %v974_v17 = vsel %vm2898_vm14, %v971_v37, %v968_v33 }
 0x1bb   :  { %2042 = vpow2.f32 %v1449_v51  ;;  %v1387_v45 = vmul.f32 1.442695, %v1293_v12  ;;  %v1294_v57 = vmul.f32 -1.5, %v974_v17  ;;  %v1253_v54 = vsel %vm1252_vm15, %v1250_v9, %v1247_v52 }
 0x1bc   :  { %v1325_v24 = vmul.f32 -1.5, %v1253_v54 }
 0x1bd   :  { %v2039_v59 = vpop.eup %2038  ;;  %2044 = vpow2.f32 %v1387_v45  ;;  %v1389_v7 = vmul.f32 1.442695, %v1294_v57 }
 0x1be   :  { %v1256_v60 = vmul.f32 0.6931472, %v2039_v59  ;;  %v1451_v62 = vmul.f32 1.442695, %v1325_v24 }
 0x1bf   :  { %2046 = vpow2.f32 %v1389_v7 }
 0x1c0   :  { %v2041_v63 = vpop.eup %2040  ;;  %v1262_v0 = vsel %vm1261_vm0, %v1259_v61, %v1256_v60  ;;  %2048 = vpow2.f32 %v1451_v62 }
 0x1c1   :  { %v2043_v18 = vpop.eup %2042  ;;  %1515 = vst [vmem:[#allocation2 + $0x1e0] sm:$0xff] %v2041_v63  ;;  %v1326_v23 = vmul.f32 -1.5, %v1262_v0 }
 0x1c2   :  { %1516 = vst [vmem:[#allocation2 + $0x1e8] sm:$0xff] %v2043_v18 }
 0x1c3   :  { %v2045_v26 = vpop.eup %2044  ;;  %v1453_v22 = vmul.f32 1.442695, %v1326_v23 }
 0x1c4   :  { %1485 = vst [vmem:[#allocation2 + $0xf0] sm:$0xff] %v2045_v26 }
 0x1c5   :  { %v2047_v34 = vpop.eup %2046  ;;  %2050 = vpow2.f32 %v1453_v22 }
 0x1c6   :  { %1486 = vst [vmem:[#allocation2 + $0xf8] sm:$0xff] %v2047_v34  ;;  %v2049_v58 = vpop.eup %2048 }
 0x1c7   :  { %1517 = vst [vmem:[#allocation2 + $0x1f0] sm:$0xff] %v2049_v58 }
 0x1cb   :  { %v2051_v53 = vpop.eup %2050 }
 0x1cc   :  { %1518 = vst [vmem:[#allocation2 + $0x1f8] sm:$0xff] %v2051_v53 }
 0x1cd   :  { %1531 = dma.vmem_to_hbm [thread:$0]  %s1524_s22, 8192, %s1526_s25, [#allocation3], %s2079_s26, %s2079_s26, %s2080_s27  }
 0x1ce   :  { %2076 = dma.done.wait [#allocation3], 8192  }
 0x1cf   :  { %2077 = vsyncadd [#allocation3], 4294959104 }
 0x1d0   :  { %1536 = vsyncpa [#allocation3], 1 }

</bundles_post_ra>
